<compile_context>
chip_gen: v7x
topology: tpu7x:2x2x1
jax: 0.10.0
libtpu: 0.0.40
codegen_flags: <defaults>
</compile_context>

<pallas_src>
import functools

import jax
import jax.numpy as jnp
from jax import lax
from jax.experimental import pallas as pl
from jax.experimental.pallas import tpu as pltpu

K = 3      # kernel size
DIL = 2    # dilation
PAD = 2    # padding (= DIL * (K-1) // 2, spatial size preserved)
BN_EPS = 1e-5


def _round_up(x, m):
    return ((x + m - 1) // m) * m


# ----------------------------------------------------------------------------
# Fused kernel: 4 x (dilated conv -> scale/shift -> ReLU -> scale/shift)
# ----------------------------------------------------------------------------
def _fused_conv_kernel(x_ref, mask_ref, w_ref, p_ref, o_ref, buf, *,
                       n_layers, taps, base, fmax, cbuf, out_c):
    # x_ref   : (1, cbuf, fmax)   flat input, channels on sublanes (zero padded)
    # mask_ref: (1, fmax)         1.0 on real pixels, 0.0 on row-stride slack
    # w_ref   : (L, cmax, K*K*cbuf) packed im2col weights (zero padded)
    # p_ref   : (L, cmax, 4)      per-channel [s1, b1, s2, b2]
    # o_ref   : (1, out_c, fmax)  lane-dense flat output of the last layer
    # buf     : (cbuf, bufw)      VMEM scratch holding the current activation
    #                             at lane offset `base` (halo regions = 0)
    mask = mask_ref[...]                               # (1, fmax)

    # Zero the scratch once per grid step; the regions outside
    # [base, base+fmax) are the top/bottom zero-padding halo.
    buf[...] = jnp.zeros_like(buf)
    buf[:, base:base + fmax] = x_ref[0] * mask         # layer-0 activation

    for l in range(n_layers):
        # im2col: each dilated tap is a constant lane offset of the flat
        # activation; stack the 9 windows along sublanes -> one MXU matmul.
        patches = jnp.concatenate(
            [buf[:, base + d:base + d + fmax] for d in taps], axis=0)
        acc = jnp.dot(w_ref[l], patches,
                      preferred_element_type=jnp.float32)       # (cmax, fmax)
        p = p_ref[l]                                            # (cmax, 4)
        y = jnp.maximum(acc * p[:, 0:1] + p[:, 1:2], 0.0) * p[:, 2:3] + p[:, 3:4]
        if l + 1 < n_layers:
            # Masking re-applies the zero padding for the next layer.
            buf[:, base:base + fmax] = y[0:cbuf] * mask
        else:
            o_ref[0] = y[0:out_c]


# ----------------------------------------------------------------------------
# Parameter construction (deterministic, PyTorch-default-like)
# ----------------------------------------------------------------------------
def _bn_affine(cout):
    # PyTorch BatchNorm2d defaults at init: gamma=1, beta=0, mean=0, var=1
    gamma = jnp.ones((cout,), jnp.float32)
    beta = jnp.zeros((cout,), jnp.float32)
    mean = jnp.zeros((cout,), jnp.float32)
    var = jnp.ones((cout,), jnp.float32)
    a = gamma / jnp.sqrt(var + BN_EPS)
    c = beta - mean * a
    return a, c


def make_params(key, in_c, out_c):
    mid = in_c - 1
    dims = [(in_c, mid), (mid, mid), (mid, mid), (mid, out_c)]
    params = []
    for (ci, co) in dims:
        key, kw, kb = jax.random.split(key, 3)
        fan_in = ci * K * K
        bound = 1.0 / jnp.sqrt(fan_in)
        w = jax.random.uniform(kw, (co, ci, K, K), jnp.float32, -bound, bound)
        b = jax.random.uniform(kb, (co,), jnp.float32, -bound, bound)
        params.append((w, b))
    return params


# ----------------------------------------------------------------------------
# Full forward (single fused pallas_call)
# ----------------------------------------------------------------------------
def conv_forward(x_nchw, params):
    x = x_nchw.astype(jnp.float32)
    N, in_c, H, W = x.shape
    (w1, b1), (w2, b2), (w3, b3), (w4, b4) = params
    mid = w1.shape[0]
    out_c = w4.shape[0]
    layer_dims = ((in_c, mid), (mid, mid), (mid, mid), (mid, out_c))
    n_layers = len(layer_dims)

    # --- flat-layout geometry -------------------------------------------------
    Wp = W + 2 * PAD                  # padded row stride
    fmax = H * Wp                     # flat spatial extent (lane axis)
    cbuf = _round_up(max(ci for ci, _ in layer_dims), 8)   # channel pad (sublanes)
    cmax = max(cbuf, max(co for _, co in layer_dims))
    k2 = K * K * cbuf                 # im2col contraction depth

    neg = PAD * (Wp + 1)                          # most negative tap offset
    pos = (DIL * (K - 1) - PAD) * (Wp + 1)        # most positive tap offset
    base = _round_up(max(neg, 128), 128)          # lane-aligned activation base
    bufw = _round_up(base + fmax + pos, 128)      # scratch lane width
    taps = tuple((DIL * ky - PAD) * Wp + (DIL * kx - PAD)
                 for ky in range(K) for kx in range(K))

    # --- one-time host-side packing --------------------------------------------
    # input: NCHW -> (N, cbuf, H*Wp): channel pad + row-stride pad, then flatten
    x_flat = jnp.pad(x, ((0, 0), (0, cbuf - in_c), (0, 0), (0, Wp - W)))
    x_flat = x_flat.reshape(N, cbuf, fmax)

    # validity mask along the flat axis (zeroes the Wp-W slack columns per row)
    mask = jnp.broadcast_to(jnp.arange(Wp) < W, (H, Wp))
    mask = mask.reshape(1, fmax).astype(jnp.float32)

    # weights: OIHW -> (cmax, K*K*cbuf), tap-major / channel-minor, zero padded
    weights = [w1, w2, w3, w4]
    W_all = jnp.zeros((n_layers, cmax, k2), jnp.float32)
    for l, ((ci, co), w) in enumerate(zip(layer_dims, weights)):
        wt = jnp.transpose(w.astype(jnp.float32), (0, 2, 3, 1))   # (co,K,K,ci)
        wt = wt.reshape(co, K * K, ci)
        wl = jnp.zeros((cmax, K * K, cbuf), jnp.float32).at[:co, :, :ci].set(wt)
        W_all = W_all.at[l].set(wl.reshape(cmax, k2))

    # per-layer per-channel epilogue: out = s2 * relu(s1 * conv + b1) + b2
    a1, c1 = _bn_affine(mid)   # bn1
    a2, c2 = _bn_affine(mid)   # bn2
    a3, c3 = _bn_affine(mid)   # bn3
    a4, c4 = _bn_affine(mid)   # bn4
    ones_m = jnp.ones((mid,), jnp.float32)
    ones_o = jnp.ones((out_c,), jnp.float32)
    zeros_o = jnp.zeros((out_c,), jnp.float32)
    epilogues = (
        (ones_m, b1, a1, c1),              # conv1 -> ReLU -> bn1
        (ones_m, b2, a2, c2),              # conv2 -> ReLU -> bn2
        (a3, a3 * b3 + c3, a4, c4),        # conv3 -> bn3 -> ReLU -> bn4
        (ones_o, b4, ones_o, zeros_o),     # conv4 -> ReLU
    )
    P_all = jnp.zeros((n_layers, cmax, 4), jnp.float32)
    for l, (s1v, b1v, s2v, b2v) in enumerate(epilogues):
        co = layer_dims[l][1]
        P_all = P_all.at[l, :co, 0].set(s1v)
        P_all = P_all.at[l, :co, 1].set(b1v)
        P_all = P_all.at[l, :co, 2].set(s2v)
        P_all = P_all.at[l, :co, 3].set(b2v)

    kern = functools.partial(
        _fused_conv_kernel, n_layers=n_layers, taps=taps, base=base,
        fmax=fmax, cbuf=cbuf, out_c=out_c)

    out_flat = pl.pallas_call(
        kern,
        out_shape=jax.ShapeDtypeStruct((N, out_c, fmax), jnp.float32),
        grid_spec=pltpu.PrefetchScalarGridSpec(
            num_scalar_prefetch=0,
            grid=(N,),
            in_specs=[
                pl.BlockSpec((1, cbuf, fmax), lambda n: (n, 0, 0)),
                pl.BlockSpec((1, fmax), lambda n: (0, 0)),
                pl.BlockSpec((n_layers, cmax, k2), lambda n: (0, 0, 0)),
                pl.BlockSpec((n_layers, cmax, 4), lambda n: (0, 0, 0)),
            ],
            out_specs=pl.BlockSpec((1, out_c, fmax), lambda n: (n, 0, 0)),
            scratch_shapes=[pltpu.VMEM((cbuf, bufw), jnp.float32)],
        ),
        compiler_params=pltpu.CompilerParams(
            dimension_semantics=("parallel",)),
    )(x_flat, mask, W_all, P_all)

    # lane-dense flat output -> NCHW (drop the Wp-W slack columns)
    out = out_flat.reshape(N, out_c, H, Wp)[:, :, :, :W]
    return out


# ----------------------------------------------------------------------------
# Pure-JAX reference (NCHW, same math) for a correctness check
# ----------------------------------------------------------------------------
def _ref_conv(x, w, b):
    y = lax.conv_general_dilated(
        x, w, window_strides=(1, 1), padding=((PAD, PAD), (PAD, PAD)),
        rhs_dilation=(DIL, DIL),
        dimension_numbers=('NCHW', 'OIHW', 'NCHW'),
        precision=lax.Precision.HIGHEST)
    return y + b[None, :, None, None]


def _ref_bn(x, cout):
    a, c = _bn_affine(cout)
    return x * a[None, :, None, None] + c[None, :, None, None]


def reference_forward(x, params):
    (w1, b1), (w2, b2), (w3, b3), (w4, b4) = params
    mid = w1.shape[0]
    x = jax.nn.relu(_ref_conv(x, w1, b1)); x = _ref_bn(x, mid)
    x = jax.nn.relu(_ref_conv(x, w2, b2)); x = _ref_bn(x, mid)
    x = _ref_bn(_ref_conv(x, w3, b3), mid); x = jax.nn.relu(x); x = _ref_bn(x, mid)
    x = jax.nn.relu(_ref_conv(x, w4, b4))
    return x


if __name__ == "__main__":
    in_c, out_c = 4, 8
    N, H, W = 2, 16, 16

    key = jax.random.PRNGKey(0)
    key, kx = jax.random.split(key)
    x = jax.random.normal(kx, (N, in_c, H, W), jnp.float32)   # NCHW input
    params = make_params(key, in_c, out_c)

    fwd = jax.jit(conv_forward)
    out = jax.block_until_ready(fwd(x, params))
    assert out.shape == (N, out_c, H, W), out.shape

    ref = jax.block_until_ready(reference_forward(x, params))
    err = jnp.max(jnp.abs(out - ref))
    if not jnp.allclose(out, ref, atol=2e-2, rtol=2e-2):
        raise AssertionError(f"kernel/reference mismatch, max abs err = {err}")

    print("KERNEL_OK")
</pallas_src>

<mosaic_0001>
module attributes {stable_mosaic.version = 11 : i64} {
  func.func @_fused_conv_kernel(%arg0: i32, %arg1: memref<1x8x320xf32, #tpu.memory_space<vmem>>, %arg2: memref<1x320xf32, #tpu.memory_space<vmem>>, %arg3: memref<4x8x72xf32, #tpu.memory_space<vmem>>, %arg4: memref<4x8x4xf32, #tpu.memory_space<vmem>>, %arg5: memref<1x8x320xf32, #tpu.memory_space<vmem>>, %arg6: memref<8x512xf32, #tpu.memory_space<vmem>>) attributes {dimension_semantics = [#tpu.dimension_semantics<parallel>], iteration_bounds = array<i64: 2>, scalar_prefetch = 0 : i64, scratch_operands = 1 : i64, tpu.core_type = #tpu.core_type<tc>, window_params = [{transform_indices = @transform_0, window_bounds = array<i64: 1, 8, 320>}, {pipeline_mode = #tpu.pipeline_mode<synchronous>, transform_indices = @transform_1, window_bounds = array<i64: 1, 320>}, {pipeline_mode = #tpu.pipeline_mode<synchronous>, transform_indices = @transform_2, window_bounds = array<i64: 4, 8, 72>}, {pipeline_mode = #tpu.pipeline_mode<synchronous>, transform_indices = @transform_3, window_bounds = array<i64: 4, 8, 4>}, {transform_indices = @transform_4, window_bounds = array<i64: 1, 8, 320>}]} {
    %c0 = arith.constant 0 : index
    %c0_0 = arith.constant 0 : index
    %0 = vector.load %arg2[%c0, %c0_0] : memref<1x320xf32, #tpu.memory_space<vmem>>, vector<1x320xf32>
    %cst = arith.constant 0.000000e+00 : f32
    %1 = vector.broadcast %cst : f32 to vector<8x512xf32>
    %c0_1 = arith.constant 0 : index
    %c0_2 = arith.constant 0 : index
    %2 = vector.load %arg6[%c0_1, %c0_2] : memref<8x512xf32, #tpu.memory_space<vmem>>, vector<8x512xf32>
    tpu.vector_store %arg6[%c0_1, %c0_2], %1 {strides = array<i32>} : memref<8x512xf32, #tpu.memory_space<vmem>>, vector<8x512xf32>,
    %c0_3 = arith.constant 0 : index
    %c0_4 = arith.constant 0 : index
    %c0_5 = arith.constant 0 : index
    %3 = vector.load %arg1[%c0_3, %c0_4, %c0_5] : memref<1x8x320xf32, #tpu.memory_space<vmem>>, vector<1x8x320xf32>
    %4 = vector.shape_cast %3 : vector<1x8x320xf32> to vector<8x320xf32>
    %5 = vector.broadcast %0 : vector<1x320xf32> to vector<8x320xf32>
    %6 = arith.mulf %4, %5 : vector<8x320xf32>
    %c0_6 = arith.constant 0 : index
    %c128 = arith.constant 128 : index
    %7 = vector.load %arg6[%c0_6, %c128] : memref<8x512xf32, #tpu.memory_space<vmem>>, vector<8x320xf32>
    tpu.vector_store %arg6[%c0_6, %c128], %6 {strides = array<i32>} : memref<8x512xf32, #tpu.memory_space<vmem>>, vector<8x320xf32>,
    %c0_7 = arith.constant 0 : index
    %c86 = arith.constant 86 : index
    %8 = vector.load %arg6[%c0_7, %c86] : memref<8x512xf32, #tpu.memory_space<vmem>>, vector<8x320xf32>
    %c0_8 = arith.constant 0 : index
    %c88 = arith.constant 88 : index
    %9 = vector.load %arg6[%c0_8, %c88] : memref<8x512xf32, #tpu.memory_space<vmem>>, vector<8x320xf32>
    %c0_9 = arith.constant 0 : index
    %c90 = arith.constant 90 : index
    %10 = vector.load %arg6[%c0_9, %c90] : memref<8x512xf32, #tpu.memory_space<vmem>>, vector<8x320xf32>
    %c0_10 = arith.constant 0 : index
    %c126 = arith.constant 126 : index
    %11 = vector.load %arg6[%c0_10, %c126] : memref<8x512xf32, #tpu.memory_space<vmem>>, vector<8x320xf32>
    %c0_11 = arith.constant 0 : index
    %c128_12 = arith.constant 128 : index
    %12 = vector.load %arg6[%c0_11, %c128_12] : memref<8x512xf32, #tpu.memory_space<vmem>>, vector<8x320xf32>
    %c0_13 = arith.constant 0 : index
    %c130 = arith.constant 130 : index
    %13 = vector.load %arg6[%c0_13, %c130] : memref<8x512xf32, #tpu.memory_space<vmem>>, vector<8x320xf32>
    %c0_14 = arith.constant 0 : index
    %c166 = arith.constant 166 : index
    %14 = vector.load %arg6[%c0_14, %c166] : memref<8x512xf32, #tpu.memory_space<vmem>>, vector<8x320xf32>
    %c0_15 = arith.constant 0 : index
    %c168 = arith.constant 168 : index
    %15 = vector.load %arg6[%c0_15, %c168] : memref<8x512xf32, #tpu.memory_space<vmem>>, vector<8x320xf32>
    %c0_16 = arith.constant 0 : index
    %c170 = arith.constant 170 : index
    %16 = vector.load %arg6[%c0_16, %c170] : memref<8x512xf32, #tpu.memory_space<vmem>>, vector<8x320xf32>
    %17 = tpu.concatenate %8, %9, %10, %11, %12, %13, %14, %15, %16 in 0 : vector<8x320xf32>, vector<8x320xf32>, vector<8x320xf32>, vector<8x320xf32>, vector<8x320xf32>, vector<8x320xf32>, vector<8x320xf32>, vector<8x320xf32>, vector<8x320xf32> -> vector<72x320xf32>
    %c0_17 = arith.constant 0 : index
    %c0_18 = arith.constant 0 : index
    %c0_19 = arith.constant 0 : index
    %18 = vector.load %arg3[%c0_17, %c0_18, %c0_19] : memref<4x8x72xf32, #tpu.memory_space<vmem>>, vector<1x8x72xf32>
    %19 = vector.shape_cast %18 : vector<1x8x72xf32> to vector<8x72xf32>
    %cst_20 = arith.constant dense<0.000000e+00> : vector<8x320xf32>
    %20 = tpu.matmul %19, %17, %cst_20 {dimension_numbers = #tpu.dot_dimension_numbers<[1], [0], [0], [1], [0, 0, 1, 1], [], []>} : vector<8x72xf32>, vector<72x320xf32>, vector<8x320xf32> -> vector<8x320xf32>
    %c0_21 = arith.constant 0 : index
    %c0_22 = arith.constant 0 : index
    %c0_23 = arith.constant 0 : index
    %21 = vector.load %arg4[%c0_21, %c0_22, %c0_23] : memref<4x8x4xf32, #tpu.memory_space<vmem>>, vector<1x8x4xf32>
    %22 = vector.shape_cast %21 : vector<1x8x4xf32> to vector<8x4xf32>
    %23 = vector.extract_strided_slice %22 {offsets = [0, 0], sizes = [8, 1], strides = [1, 1]} : vector<8x4xf32> to vector<8x1xf32>
    %24 = vector.broadcast %23 : vector<8x1xf32> to vector<8x320xf32>
    %25 = arith.mulf %20, %24 : vector<8x320xf32>
    %26 = vector.extract_strided_slice %22 {offsets = [0, 1], sizes = [8, 1], strides = [1, 1]} : vector<8x4xf32> to vector<8x1xf32>
    %27 = vector.broadcast %26 : vector<8x1xf32> to vector<8x320xf32>
    %28 = arith.addf %25, %27 : vector<8x320xf32>
    %cst_24 = arith.constant 0.000000e+00 : f32
    %29 = vector.broadcast %cst_24 : f32 to vector<8x320xf32>
    %30 = arith.maximumf %28, %29 : vector<8x320xf32>
    %31 = vector.extract_strided_slice %22 {offsets = [0, 2], sizes = [8, 1], strides = [1, 1]} : vector<8x4xf32> to vector<8x1xf32>
    %32 = vector.broadcast %31 : vector<8x1xf32> to vector<8x320xf32>
    %33 = arith.mulf %30, %32 : vector<8x320xf32>
    %34 = vector.extract_strided_slice %22 {offsets = [0, 3], sizes = [8, 1], strides = [1, 1]} : vector<8x4xf32> to vector<8x1xf32>
    %35 = vector.broadcast %34 : vector<8x1xf32> to vector<8x320xf32>
    %36 = arith.addf %33, %35 : vector<8x320xf32>
    %37 = vector.broadcast %0 : vector<1x320xf32> to vector<8x320xf32>
    %38 = arith.mulf %36, %37 : vector<8x320xf32>
    %c0_25 = arith.constant 0 : index
    %c128_26 = arith.constant 128 : index
    %39 = vector.load %arg6[%c0_25, %c128_26] : memref<8x512xf32, #tpu.memory_space<vmem>>, vector<8x320xf32>
    tpu.vector_store %arg6[%c0_25, %c128_26], %38 {strides = array<i32>} : memref<8x512xf32, #tpu.memory_space<vmem>>, vector<8x320xf32>,
    %c0_27 = arith.constant 0 : index
    %c86_28 = arith.constant 86 : index
    %40 = vector.load %arg6[%c0_27, %c86_28] : memref<8x512xf32, #tpu.memory_space<vmem>>, vector<8x320xf32>
    %c0_29 = arith.constant 0 : index
    %c88_30 = arith.constant 88 : index
    %41 = vector.load %arg6[%c0_29, %c88_30] : memref<8x512xf32, #tpu.memory_space<vmem>>, vector<8x320xf32>
    %c0_31 = arith.constant 0 : index
    %c90_32 = arith.constant 90 : index
    %42 = vector.load %arg6[%c0_31, %c90_32] : memref<8x512xf32, #tpu.memory_space<vmem>>, vector<8x320xf32>
    %c0_33 = arith.constant 0 : index
    %c126_34 = arith.constant 126 : index
    %43 = vector.load %arg6[%c0_33, %c126_34] : memref<8x512xf32, #tpu.memory_space<vmem>>, vector<8x320xf32>
    %c0_35 = arith.constant 0 : index
    %c128_36 = arith.constant 128 : index
    %44 = vector.load %arg6[%c0_35, %c128_36] : memref<8x512xf32, #tpu.memory_space<vmem>>, vector<8x320xf32>
    %c0_37 = arith.constant 0 : index
    %c130_38 = arith.constant 130 : index
    %45 = vector.load %arg6[%c0_37, %c130_38] : memref<8x512xf32, #tpu.memory_space<vmem>>, vector<8x320xf32>
    %c0_39 = arith.constant 0 : index
    %c166_40 = arith.constant 166 : index
    %46 = vector.load %arg6[%c0_39, %c166_40] : memref<8x512xf32, #tpu.memory_space<vmem>>, vector<8x320xf32>
    %c0_41 = arith.constant 0 : index
    %c168_42 = arith.constant 168 : index
    %47 = vector.load %arg6[%c0_41, %c168_42] : memref<8x512xf32, #tpu.memory_space<vmem>>, vector<8x320xf32>
    %c0_43 = arith.constant 0 : index
    %c170_44 = arith.constant 170 : index
    %48 = vector.load %arg6[%c0_43, %c170_44] : memref<8x512xf32, #tpu.memory_space<vmem>>, vector<8x320xf32>
    %49 = tpu.concatenate %40, %41, %42, %43, %44, %45, %46, %47, %48 in 0 : vector<8x320xf32>, vector<8x320xf32>, vector<8x320xf32>, vector<8x320xf32>, vector<8x320xf32>, vector<8x320xf32>, vector<8x320xf32>, vector<8x320xf32>, vector<8x320xf32> -> vector<72x320xf32>
    %c1 = arith.constant 1 : index
    %c0_45 = arith.constant 0 : index
    %c0_46 = arith.constant 0 : index
    %50 = vector.load %arg3[%c1, %c0_45, %c0_46] : memref<4x8x72xf32, #tpu.memory_space<vmem>>, vector<1x8x72xf32>
    %51 = vector.shape_cast %50 : vector<1x8x72xf32> to vector<8x72xf32>
    %cst_47 = arith.constant dense<0.000000e+00> : vector<8x320xf32>
    %52 = tpu.matmul %51, %49, %cst_47 {dimension_numbers = #tpu.dot_dimension_numbers<[1], [0], [0], [1], [0, 0, 1, 1], [], []>} : vector<8x72xf32>, vector<72x320xf32>, vector<8x320xf32> -> vector<8x320xf32>
    %c1_48 = arith.constant 1 : index
    %c0_49 = arith.constant 0 : index
    %c0_50 = arith.constant 0 : index
    %53 = vector.load %arg4[%c1_48, %c0_49, %c0_50] : memref<4x8x4xf32, #tpu.memory_space<vmem>>, vector<1x8x4xf32>
    %54 = vector.shape_cast %53 : vector<1x8x4xf32> to vector<8x4xf32>
    %55 = vector.extract_strided_slice %54 {offsets = [0, 0], sizes = [8, 1], strides = [1, 1]} : vector<8x4xf32> to vector<8x1xf32>
    %56 = vector.broadcast %55 : vector<8x1xf32> to vector<8x320xf32>
    %57 = arith.mulf %52, %56 : vector<8x320xf32>
    %58 = vector.extract_strided_slice %54 {offsets = [0, 1], sizes = [8, 1], strides = [1, 1]} : vector<8x4xf32> to vector<8x1xf32>
    %59 = vector.broadcast %58 : vector<8x1xf32> to vector<8x320xf32>
    %60 = arith.addf %57, %59 : vector<8x320xf32>
    %cst_51 = arith.constant 0.000000e+00 : f32
    %61 = vector.broadcast %cst_51 : f32 to vector<8x320xf32>
    %62 = arith.maximumf %60, %61 : vector<8x320xf32>
    %63 = vector.extract_strided_slice %54 {offsets = [0, 2], sizes = [8, 1], strides = [1, 1]} : vector<8x4xf32> to vector<8x1xf32>
    %64 = vector.broadcast %63 : vector<8x1xf32> to vector<8x320xf32>
    %65 = arith.mulf %62, %64 : vector<8x320xf32>
    %66 = vector.extract_strided_slice %54 {offsets = [0, 3], sizes = [8, 1], strides = [1, 1]} : vector<8x4xf32> to vector<8x1xf32>
    %67 = vector.broadcast %66 : vector<8x1xf32> to vector<8x320xf32>
    %68 = arith.addf %65, %67 : vector<8x320xf32>
    %69 = vector.broadcast %0 : vector<1x320xf32> to vector<8x320xf32>
    %70 = arith.mulf %68, %69 : vector<8x320xf32>
    %c0_52 = arith.constant 0 : index
    %c128_53 = arith.constant 128 : index
    %71 = vector.load %arg6[%c0_52, %c128_53] : memref<8x512xf32, #tpu.memory_space<vmem>>, vector<8x320xf32>
    tpu.vector_store %arg6[%c0_52, %c128_53], %70 {strides = array<i32>} : memref<8x512xf32, #tpu.memory_space<vmem>>, vector<8x320xf32>,
    %c0_54 = arith.constant 0 : index
    %c86_55 = arith.constant 86 : index
    %72 = vector.load %arg6[%c0_54, %c86_55] : memref<8x512xf32, #tpu.memory_space<vmem>>, vector<8x320xf32>
    %c0_56 = arith.constant 0 : index
    %c88_57 = arith.constant 88 : index
    %73 = vector.load %arg6[%c0_56, %c88_57] : memref<8x512xf32, #tpu.memory_space<vmem>>, vector<8x320xf32>
    %c0_58 = arith.constant 0 : index
    %c90_59 = arith.constant 90 : index
    %74 = vector.load %arg6[%c0_58, %c90_59] : memref<8x512xf32, #tpu.memory_space<vmem>>, vector<8x320xf32>
    %c0_60 = arith.constant 0 : index
    %c126_61 = arith.constant 126 : index
    %75 = vector.load %arg6[%c0_60, %c126_61] : memref<8x512xf32, #tpu.memory_space<vmem>>, vector<8x320xf32>
    %c0_62 = arith.constant 0 : index
    %c128_63 = arith.constant 128 : index
    %76 = vector.load %arg6[%c0_62, %c128_63] : memref<8x512xf32, #tpu.memory_space<vmem>>, vector<8x320xf32>
    %c0_64 = arith.constant 0 : index
    %c130_65 = arith.constant 130 : index
    %77 = vector.load %arg6[%c0_64, %c130_65] : memref<8x512xf32, #tpu.memory_space<vmem>>, vector<8x320xf32>
    %c0_66 = arith.constant 0 : index
    %c166_67 = arith.constant 166 : index
    %78 = vector.load %arg6[%c0_66, %c166_67] : memref<8x512xf32, #tpu.memory_space<vmem>>, vector<8x320xf32>
    %c0_68 = arith.constant 0 : index
    %c168_69 = arith.constant 168 : index
    %79 = vector.load %arg6[%c0_68, %c168_69] : memref<8x512xf32, #tpu.memory_space<vmem>>, vector<8x320xf32>
    %c0_70 = arith.constant 0 : index
    %c170_71 = arith.constant 170 : index
    %80 = vector.load %arg6[%c0_70, %c170_71] : memref<8x512xf32, #tpu.memory_space<vmem>>, vector<8x320xf32>
    %81 = tpu.concatenate %72, %73, %74, %75, %76, %77, %78, %79, %80 in 0 : vector<8x320xf32>, vector<8x320xf32>, vector<8x320xf32>, vector<8x320xf32>, vector<8x320xf32>, vector<8x320xf32>, vector<8x320xf32>, vector<8x320xf32>, vector<8x320xf32> -> vector<72x320xf32>
    %c2 = arith.constant 2 : index
    %c0_72 = arith.constant 0 : index
    %c0_73 = arith.constant 0 : index
    %82 = vector.load %arg3[%c2, %c0_72, %c0_73] : memref<4x8x72xf32, #tpu.memory_space<vmem>>, vector<1x8x72xf32>
    %83 = vector.shape_cast %82 : vector<1x8x72xf32> to vector<8x72xf32>
    %cst_74 = arith.constant dense<0.000000e+00> : vector<8x320xf32>
    %84 = tpu.matmul %83, %81, %cst_74 {dimension_numbers = #tpu.dot_dimension_numbers<[1], [0], [0], [1], [0, 0, 1, 1], [], []>} : vector<8x72xf32>, vector<72x320xf32>, vector<8x320xf32> -> vector<8x320xf32>
    %c2_75 = arith.constant 2 : index
    %c0_76 = arith.constant 0 : index
    %c0_77 = arith.constant 0 : index
    %85 = vector.load %arg4[%c2_75, %c0_76, %c0_77] : memref<4x8x4xf32, #tpu.memory_space<vmem>>, vector<1x8x4xf32>
    %86 = vector.shape_cast %85 : vector<1x8x4xf32> to vector<8x4xf32>
    %87 = vector.extract_strided_slice %86 {offsets = [0, 0], sizes = [8, 1], strides = [1, 1]} : vector<8x4xf32> to vector<8x1xf32>
    %88 = vector.broadcast %87 : vector<8x1xf32> to vector<8x320xf32>
    %89 = arith.mulf %84, %88 : vector<8x320xf32>
    %90 = vector.extract_strided_slice %86 {offsets = [0, 1], sizes = [8, 1], strides = [1, 1]} : vector<8x4xf32> to vector<8x1xf32>
    %91 = vector.broadcast %90 : vector<8x1xf32> to vector<8x320xf32>
    %92 = arith.addf %89, %91 : vector<8x320xf32>
    %cst_78 = arith.constant 0.000000e+00 : f32
    %93 = vector.broadcast %cst_78 : f32 to vector<8x320xf32>
    %94 = arith.maximumf %92, %93 : vector<8x320xf32>
    %95 = vector.extract_strided_slice %86 {offsets = [0, 2], sizes = [8, 1], strides = [1, 1]} : vector<8x4xf32> to vector<8x1xf32>
    %96 = vector.broadcast %95 : vector<8x1xf32> to vector<8x320xf32>
    %97 = arith.mulf %94, %96 : vector<8x320xf32>
    %98 = vector.extract_strided_slice %86 {offsets = [0, 3], sizes = [8, 1], strides = [1, 1]} : vector<8x4xf32> to vector<8x1xf32>
    %99 = vector.broadcast %98 : vector<8x1xf32> to vector<8x320xf32>
    %100 = arith.addf %97, %99 : vector<8x320xf32>
    %101 = vector.broadcast %0 : vector<1x320xf32> to vector<8x320xf32>
    %102 = arith.mulf %100, %101 : vector<8x320xf32>
    %c0_79 = arith.constant 0 : index
    %c128_80 = arith.constant 128 : index
    %103 = vector.load %arg6[%c0_79, %c128_80] : memref<8x512xf32, #tpu.memory_space<vmem>>, vector<8x320xf32>
    tpu.vector_store %arg6[%c0_79, %c128_80], %102 {strides = array<i32>} : memref<8x512xf32, #tpu.memory_space<vmem>>, vector<8x320xf32>,
    %c0_81 = arith.constant 0 : index
    %c86_82 = arith.constant 86 : index
    %104 = vector.load %arg6[%c0_81, %c86_82] : memref<8x512xf32, #tpu.memory_space<vmem>>, vector<8x320xf32>
    %c0_83 = arith.constant 0 : index
    %c88_84 = arith.constant 88 : index
    %105 = vector.load %arg6[%c0_83, %c88_84] : memref<8x512xf32, #tpu.memory_space<vmem>>, vector<8x320xf32>
    %c0_85 = arith.constant 0 : index
    %c90_86 = arith.constant 90 : index
    %106 = vector.load %arg6[%c0_85, %c90_86] : memref<8x512xf32, #tpu.memory_space<vmem>>, vector<8x320xf32>
    %c0_87 = arith.constant 0 : index
    %c126_88 = arith.constant 126 : index
    %107 = vector.load %arg6[%c0_87, %c126_88] : memref<8x512xf32, #tpu.memory_space<vmem>>, vector<8x320xf32>
    %c0_89 = arith.constant 0 : index
    %c128_90 = arith.constant 128 : index
    %108 = vector.load %arg6[%c0_89, %c128_90] : memref<8x512xf32, #tpu.memory_space<vmem>>, vector<8x320xf32>
    %c0_91 = arith.constant 0 : index
    %c130_92 = arith.constant 130 : index
    %109 = vector.load %arg6[%c0_91, %c130_92] : memref<8x512xf32, #tpu.memory_space<vmem>>, vector<8x320xf32>
    %c0_93 = arith.constant 0 : index
    %c166_94 = arith.constant 166 : index
    %110 = vector.load %arg6[%c0_93, %c166_94] : memref<8x512xf32, #tpu.memory_space<vmem>>, vector<8x320xf32>
    %c0_95 = arith.constant 0 : index
    %c168_96 = arith.constant 168 : index
    %111 = vector.load %arg6[%c0_95, %c168_96] : memref<8x512xf32, #tpu.memory_space<vmem>>, vector<8x320xf32>
    %c0_97 = arith.constant 0 : index
    %c170_98 = arith.constant 170 : index
    %112 = vector.load %arg6[%c0_97, %c170_98] : memref<8x512xf32, #tpu.memory_space<vmem>>, vector<8x320xf32>
    %113 = tpu.concatenate %104, %105, %106, %107, %108, %109, %110, %111, %112 in 0 : vector<8x320xf32>, vector<8x320xf32>, vector<8x320xf32>, vector<8x320xf32>, vector<8x320xf32>, vector<8x320xf32>, vector<8x320xf32>, vector<8x320xf32>, vector<8x320xf32> -> vector<72x320xf32>
    %c3 = arith.constant 3 : index
    %c0_99 = arith.constant 0 : index
    %c0_100 = arith.constant 0 : index
    %114 = vector.load %arg3[%c3, %c0_99, %c0_100] : memref<4x8x72xf32, #tpu.memory_space<vmem>>, vector<1x8x72xf32>
    %115 = vector.shape_cast %114 : vector<1x8x72xf32> to vector<8x72xf32>
    %cst_101 = arith.constant dense<0.000000e+00> : vector<8x320xf32>
    %116 = tpu.matmul %115, %113, %cst_101 {dimension_numbers = #tpu.dot_dimension_numbers<[1], [0], [0], [1], [0, 0, 1, 1], [], []>} : vector<8x72xf32>, vector<72x320xf32>, vector<8x320xf32> -> vector<8x320xf32>
    %c3_102 = arith.constant 3 : index
    %c0_103 = arith.constant 0 : index
    %c0_104 = arith.constant 0 : index
    %117 = vector.load %arg4[%c3_102, %c0_103, %c0_104] : memref<4x8x4xf32, #tpu.memory_space<vmem>>, vector<1x8x4xf32>
    %118 = vector.shape_cast %117 : vector<1x8x4xf32> to vector<8x4xf32>
    %119 = vector.extract_strided_slice %118 {offsets = [0, 0], sizes = [8, 1], strides = [1, 1]} : vector<8x4xf32> to vector<8x1xf32>
    %120 = vector.broadcast %119 : vector<8x1xf32> to vector<8x320xf32>
    %121 = arith.mulf %116, %120 : vector<8x320xf32>
    %122 = vector.extract_strided_slice %118 {offsets = [0, 1], sizes = [8, 1], strides = [1, 1]} : vector<8x4xf32> to vector<8x1xf32>
    %123 = vector.broadcast %122 : vector<8x1xf32> to vector<8x320xf32>
    %124 = arith.addf %121, %123 : vector<8x320xf32>
    %cst_105 = arith.constant 0.000000e+00 : f32
    %125 = vector.broadcast %cst_105 : f32 to vector<8x320xf32>
    %126 = arith.maximumf %124, %125 : vector<8x320xf32>
    %127 = vector.extract_strided_slice %118 {offsets = [0, 2], sizes = [8, 1], strides = [1, 1]} : vector<8x4xf32> to vector<8x1xf32>
    %128 = vector.broadcast %127 : vector<8x1xf32> to vector<8x320xf32>
    %129 = arith.mulf %126, %128 : vector<8x320xf32>
    %130 = vector.extract_strided_slice %118 {offsets = [0, 3], sizes = [8, 1], strides = [1, 1]} : vector<8x4xf32> to vector<8x1xf32>
    %131 = vector.broadcast %130 : vector<8x1xf32> to vector<8x320xf32>
    %132 = arith.addf %129, %131 : vector<8x320xf32>
    %c0_106 = arith.constant 0 : index
    %c0_107 = arith.constant 0 : index
    %c0_108 = arith.constant 0 : index
    %133 = vector.load %arg5[%c0_106, %c0_107, %c0_108] : memref<1x8x320xf32, #tpu.memory_space<vmem>>, vector<1x8x320xf32>
    %134 = vector.shape_cast %133 : vector<1x8x320xf32> to vector<8x320xf32>
    %135 = vector.shape_cast %132 : vector<8x320xf32> to vector<1x8x320xf32>
    tpu.vector_store %arg5[%c0_106, %c0_107, %c0_108], %135 {strides = array<i32>} : memref<1x8x320xf32, #tpu.memory_space<vmem>>, vector<1x8x320xf32>,
    return
  }
  func.func @transform_0(%arg0: i32) -> (i32, i32, i32) {
    %c0_i32 = arith.constant 0 : i32
    %c0_i32_0 = arith.constant 0 : i32
    %c0_i32_1 = arith.constant 0 : i32
    return %arg0, %c0_i32, %c0_i32_0 : i32, i32, i32
  }
  func.func @transform_1(%arg0: i32) -> (i32, i32) {
    %c0_i32 = arith.constant 0 : i32
    %c0_i32_0 = arith.constant 0 : i32
    %c0_i32_1 = arith.constant 0 : i32
    return %c0_i32, %c0_i32_0 : i32, i32
  }
  func.func @transform_2(%arg0: i32) -> (i32, i32, i32) {
    %c0_i32 = arith.constant 0 : i32
    %c0_i32_0 = arith.constant 0 : i32
    %c0_i32_1 = arith.constant 0 : i32
    %c0_i32_2 = arith.constant 0 : i32
    return %c0_i32, %c0_i32_0, %c0_i32_1 : i32, i32, i32
  }
  func.func @transform_3(%arg0: i32) -> (i32, i32, i32) {
    %c0_i32 = arith.constant 0 : i32
    %c0_i32_0 = arith.constant 0 : i32
    %c0_i32_1 = arith.constant 0 : i32
    %c0_i32_2 = arith.constant 0 : i32
    return %c0_i32, %c0_i32_0, %c0_i32_1 : i32, i32, i32
  }
  func.func @transform_4(%arg0: i32) -> (i32, i32, i32) {
    %c0_i32 = arith.constant 0 : i32
    %c0_i32_0 = arith.constant 0 : i32
    %c0_i32_1 = arith.constant 0 : i32
    return %arg0, %c0_i32, %c0_i32_0 : i32, i32, i32
  }
}

</mosaic_0001>

<bundles_post_ra>
// kernel: conv_forward.1
= control target key start
LH: loop header
LB: loop body
LE: loop exit
PB: predicated region body
PF: predicated region fallthrough
CT: control target
= control target key end

     0   :  { %s2730_s15 = smov 0   ;;  %s3309_s0 = inlined_call_operand.vmem [shape: f32[2,8,320], index: 0, kind: input, shape index: {}]   ;;  %s3310_s1 = inlined_call_operand.vmem [shape: f32[1,320], index: 1, kind: input, shape index: {}]   ;;  %s3311_s2 = inlined_call_operand.vmem [shape: f32[4,8,72], index: 2, kind: input, shape index: {}]   ;;  %s3312_s3 = inlined_call_operand.vmem [shape: f32[4,8,4], index: 3, kind: input, shape index: {}]   ;;  %s3313_s4 = inlined_call_operand.vmem [shape: f32[2,8,320], index: 4, kind: output, shape index: {}]  }
   0x1 LB: > { %s1861_s16 = sadd.s32 4294967295, %s2687_s15   ;;  %p1865_p0 = scmp.ge.s32.totalorder %s2687_s15, 1  ;;  %s2687_s15 = sphi %s2730_s15, %s14_s15  }
   0x2   : > { %p162_p1 = scmp.lt.s32.totalorder %s2687_s15, 3 }
   0x4   : > { %p163_p2 = pnand %p1865_p0, %p162_p1 }
   0x5   : > { %p188_p3 = scmp.lt.s32.totalorder (!%p163_p2), %s1861_s16, 1  ;;  %v207_v0 = vlaneseq (!%p163_p2)  ;;  %v2689_v1 = vmov (!%p163_p2), 0.0   ;;  %v198_v3 = vld [vmem:[%s3310_s1] sm:$0x7] (!%p163_p2)  ;;  %vm227_vm0 = vcmask (!%p163_p2), 523264   ;;  %s2690_s23 = smov (!%p163_p2), 124  }
   0x6   : > { %166 = sbr.rel (%p163_p2) target bundleno = 2093 (0x82d), region = 36  ;;  %199 = vst [vmem:[#allocation2] sm:$0xff] (!%p163_p2), %v2689_v1  ;;  %202 = vst [vmem:[#allocation2 + $0x18] sm:$0xff] (!%p163_p2), %v2689_v1  ;;  %514 = vmatprep.mubr.f32.mxu0 (!%p163_p2), %v2689_v1  ;;  %s2691_s24 = smov (!%p163_p2), 126   ;;  %v2699_v40 = vmov (!%p163_p2), 0.0|0.0   ;;  %vm245_vm1 = vcmask (!%p163_p2), 1031168  }
   0x7   : > { %v208_v2 = vshrl.u32 (!%p163_p2), %v207_v0, 7  ;;  %s2692_s25 = smov (!%p163_p2), 88   ;;  %s2693_s26 = smov (!%p163_p2), 86   ;;  %2024 = vmatprep.subr.bf16.mxu1 (!%p163_p2), %v2699_v40  ;;  %vm269_vm2 = vcmask (!%p163_p2), 719872   ;;  %vm257_vm3 = vcmask (!%p163_p2), 1014784   ;;  %vm288_vm4 = vcmask (!%p163_p2), 687104  }
   0x8   : > { %s2694_s27 = smov (!%p163_p2), 84   ;;  %s2695_s28 = smov (!%p163_p2), 48   ;;  %vm306_vm5 = vcmask (!%p163_p2), 375808   ;;  %vm279_vm6 = vcmask (!%p163_p2), 703488   ;;  %vm297_vm7 = vcmask (!%p163_p2), 392192   ;;  %vm315_vm8 = vcmask (!%p163_p2), 359424  }
   0x9   : > { %v209_v4 = vsub.s32 (!%p163_p2), 0, %v208_v2  ;;  %v213_v5 = vsub.s32 (!%p163_p2), 1, %v208_v2  ;;  %v217_v6 = vsub.s32 (!%p163_p2), 2, %v208_v2  ;;  %s2696_s29 = smov (!%p163_p2), 46   ;;  %s2697_s30 = smov (!%p163_p2), 44   ;;  %vm2700_vm9 = vmmov (!%p163_p2), 0  }
   0xa   : > { %s2698_s5 = smov (!%p163_p2), 42   ;;  %1942 = vmatprep.mubr.msk.f32.mxu1 (!%p163_p2), %vm2700_vm9, %v2689_v1  ;;  %vm391_vm10 = vcmask (!%p163_p2), 343040   ;;  %vm446_vm11 = vcmask (!%p163_p2), 588800  }
   0xb   : > { %v2752_v7 = vrot.slane (!%p163_p2), %v198_v3, %v209_v4  ;;  %v2754_v8 = vrot.slane (!%p163_p2), %v198_v3, %v213_v5  ;;  %v2756_v9 = vrot.slane (!%p163_p2), %v198_v3, %v217_v6 }
   0xd   : > { %s3315_s16 = smov (!%p188_p3, %s1861_s16), 1 }
   0xe   : > { %s2120_s19 = smul.u32 24, %s3315_s16 }
  0x10   : > { %s192_s22 = scalar_lea.vmem %s3309_s0, %s2120_s19 }
  0x11   : > { %v203_v10 = vld [vmem:[%s192_s22] sm:$0xff]  ;;  %v204_v11 = vld [vmem:[%s192_s22 + $0x8] sm:$0xff]  ;;  %v205_v12 = vld [vmem:[%s192_s22 + $0x10] sm:$0xff] }
  0x12   : > { %v222_v13 = vmul.f32 %v2752_v7, %v203_v10  ;;  %v223_v14 = vmul.f32 %v2754_v8, %v204_v11  ;;  %v224_v15 = vmul.f32 %v2756_v9, %v205_v12 }
  0x14   : > { %v2155_v16 = vpack.i.bf16 %v223_v14, %v222_v13  ;;  %228 = vst.msk [vmem:[#allocation2 + $0x18] sm:$0xff] %vm227_vm0, %v224_v15 }
  0x16   : > { %2156 = vrot.lane.b32.xlu1 %v2155_v16, %s2690_s23  ;;  %2146 = vrot.lane.b32.xlu0 %v2155_v16, %s2691_s24 }
  0x1b   : > { %v232_v17 = vld [vmem:[#allocation2 + $0x18] sm:$0xff] }
  0x1c   : > { %v2160_v18 = vpack.i.bf16 %v2689_v1, %v232_v17 }
  0x1e   : > { %2161 = vrot.lane.b32.xlu1 %v2160_v18, %s2690_s23  ;;  %2151 = vrot.lane.b32.xlu0 %v2160_v18, %s2691_s24 }
  0x22   : > { %2171 = vrot.lane.b32.xlu1 %v2160_v18, %s2692_s25  ;;  %2166 = vrot.lane.b32.xlu0 %v2155_v16, %s2692_s25 }
  0x26   : > { %277 = vrot.lane.b32.xlu1 %v232_v17, %s2693_s26  ;;  %2176 = vrot.lane.b32.xlu0 %v2155_v16, %s2693_s26 }
  0x2a   : > { %286 = vrot.lane.b32.xlu1 %v232_v17, %s2694_s27  ;;  %2181 = vrot.lane.b32.xlu0 %v2155_v16, %s2694_s27 }
  0x2e   : > { %295 = vrot.lane.b32.xlu1 %v232_v17, %s2695_s28  ;;  %2186 = vrot.lane.b32.xlu0 %v2155_v16, %s2695_s28 }
  0x32   : > { %304 = vrot.lane.b32.xlu1 %v232_v17, %s2696_s29  ;;  %2191 = vrot.lane.b32.xlu0 %v2155_v16, %s2696_s29 }
  0x36   : > { %309 = vrot.lane.b32.xlu0 %v222_v13, %s2697_s30  ;;  %311 = vrot.lane.b32.xlu1 %v223_v14, %s2697_s30 }
  0x3a   : > { %313 = vrot.lane.b32.xlu0 %v232_v17, %s2697_s30  ;;  %2196 = vrot.lane.b32.xlu1 %v2155_v16, %s2698_s5 }
  0x88   : > { %v2781_v19 = vpop.permute.xlu1 %2156  ;;  %v2147_v20 = vpop.permute.xlu0 %2146 }
  0x89   : > { %v2149_v41 = vunpack.i.h.bf16 %v2147_v20  ;;  %v2148_v42 = vunpack.i.l.bf16 %v2147_v20  ;;  %v2159_v53 = vunpack.i.h.bf16 %v2781_v19  ;;  %v2158_v54 = vunpack.i.l.bf16 %v2781_v19 }
  0x8b   : > { %v247_v55 = vsel %vm245_vm1, %v2148_v42, %v2149_v41  ;;  %v259_v63 = vsel %vm257_vm3, %v2158_v54, %v2159_v53 }
  0x90   : > { %v2783_v21 = vpop.permute.xlu1 %2161  ;;  %v2152_v22 = vpop.permute.xlu0 %2151 }
  0x91   : > { %v2153_v23 = vunpack.i.l.bf16 %v2152_v22  ;;  %v2163_v27 = vunpack.i.l.bf16 %v2783_v21  ;;  %v2154_v43 = vunpack.i.h.bf16 %v2152_v22  ;;  %v2164_v3 = vunpack.i.h.bf16 %v2783_v21 }
  0x93   : > { %v2200_v24 = vpack.i.bf16 %v2153_v23, %v232_v17  ;;  %v248_v51 = vsel %vm245_vm1, %v2149_v41, %v2153_v23  ;;  %v246_v56 = vsel %vm245_vm1, %v2154_v43, %v2148_v42  ;;  %v260_v0 = vsel %vm257_vm3, %v2159_v53, %v2163_v27 }
  0x94   : > { %v2785_v25 = vpop.permute.xlu1 %2171  ;;  %v2787_v26 = vpop.permute.xlu0 %2166  ;;  %v2230_v57 = vpack.i.bf16 %v248_v51, %v247_v55  ;;  %v2235_v61 = vpack.i.bf16 %v246_v56, %v2689_v1  ;;  %v2240_v10 = vpack.i.bf16 %v260_v0, %v259_v63  ;;  %v258_v15 = vsel %vm257_vm3, %v2164_v3, %v2158_v54 }
  0x95   : > { %v2173_v28 = vunpack.i.l.bf16 %v2785_v25  ;;  %2201 = vrot.lane.b32.xlu0 %v2200_v24, %s2698_s5  ;;  %v2169_v49 = vunpack.i.h.bf16 %v2787_v26  ;;  %v2168_v50 = vunpack.i.l.bf16 %v2787_v26  ;;  %v2174_v62 = vunpack.i.h.bf16 %v2785_v25 }
  0x97   : > { %v2205_v29 = vpack.i.bf16 %v2173_v28, %v2163_v27  ;;  %v271_v59 = vsel %vm269_vm2, %v2168_v50, %v2169_v49  ;;  %v272_v60 = vsel %vm269_vm2, %v2169_v49, %v2173_v28  ;;  %v270_v13 = vsel %vm269_vm2, %v2174_v62, %v2168_v50 }
  0x98   : > { %v2792_v30 = vpop.permute.xlu1 %277  ;;  %v2794_v31 = vpop.permute.xlu0 %2176  ;;  %v2245_v2 = vpack.i.bf16 %v272_v60, %v271_v59  ;;  %v2250_v18 = vpack.i.bf16 %v270_v13, %v258_v15 }
  0x99   : > { %2206 = vrot.lane.b32.xlu0 %v2205_v29, %s2698_s5  ;;  %v2178_v34 = vunpack.i.l.bf16 %v2794_v31  ;;  %v2179_v12 = vunpack.i.h.bf16 %v2794_v31  ;;  %v2702_v31 = vmov 1  }
  0x9a   : > { %2276 = vset.pattern.permute.xlu0 %v2702_v31 }
  0x9b   : > { %v280_v20 = vsel %vm279_vm6, %v2178_v34, %v2179_v12  ;;  %v281_v21 = vsel %vm279_vm6, %v2179_v12, %v2792_v30 }
  0x9c   : > { %v287_v32 = vpop.permute.xlu1 %286  ;;  %v2182_v33 = vpop.permute.xlu0 %2181  ;;  %v2255_v25 = vpack.i.bf16 %v281_v21, %v280_v20 }
  0x9d   : > { %v2215_v35 = vpack.i.bf16 %v287_v32, %v2792_v30  ;;  %v2183_v36 = vunpack.i.l.bf16 %v2182_v33  ;;  %v2184_v58 = vunpack.i.h.bf16 %v2182_v33  ;;  %v2701_v30 = vmov 0   ;;  %v591_v33 = vld [vmem:[%s3312_s3] sm:$0xff] }
  0x9e   : > { %2275 = vset.pattern.permute.xlu1 %v2701_v30 }
  0x9f   : > { %v2210_v37 = vpack.i.bf16 %v2183_v36, %v2178_v34  ;;  %2216 = vrot.lane.b32.xlu0 %v2215_v35, %s2698_s5  ;;  %v289_v5 = vsel %vm288_vm4, %v2183_v36, %v2184_v58  ;;  %v290_v6 = vsel %vm288_vm4, %v2184_v58, %v287_v32  ;;  %v2703_v34 = vmov 2  }
  0xa0   : > { %v2802_v38 = vpop.permute.xlu1 %295  ;;  %v2804_v39 = vpop.permute.xlu0 %2186  ;;  %v2260_v14 = vpack.i.bf16 %v290_v6, %v289_v5  ;;  %v2704_v35 = vmov 3  }
  0xa1   : > { %2211 = vrot.lane.b32.xlu1 %v2210_v37, %s2698_s5  ;;  %v2188_v46 = vunpack.i.l.bf16 %v2804_v39  ;;  %v2189_v19 = vunpack.i.h.bf16 %v2804_v39 }
  0xa3   : > { %v298_v26 = vsel %vm297_vm7, %v2188_v46, %v2189_v19  ;;  %v299_v27 = vsel %vm297_vm7, %v2189_v19, %v2802_v38 }
  0xa4   : > { %v305_v44 = vpop.permute.xlu1 %304  ;;  %v2192_v45 = vpop.permute.xlu0 %2191  ;;  %v2265_v29 = vpack.i.bf16 %v299_v27, %v298_v26 }
  0xa5   : > { %v2225_v47 = vpack.i.bf16 %v305_v44, %v2802_v38  ;;  %v2193_v48 = vunpack.i.l.bf16 %v2192_v45  ;;  %v2194_v4 = vunpack.i.h.bf16 %v2192_v45 }
  0xa7   : > { %2226 = vrot.lane.b32.xlu0 %v2225_v47, %s2698_s5  ;;  %v2220_v52 = vpack.i.bf16 %v2193_v48, %v2188_v46  ;;  %v307_v16 = vsel %vm306_vm5, %v2193_v48, %v2194_v4  ;;  %v308_v17 = vsel %vm306_vm5, %v2194_v4, %v305_v44 }
  0xa8   : > { %v310_v11 = vpop.permute.xlu0 %309  ;;  %v2270_v22 = vpack.i.bf16 %v308_v17, %v307_v16  ;;  %v312_v23 = vpop.permute.xlu1 %311 }
  0xa9   : > { %2221 = vrot.lane.b32.xlu1 %v2220_v52, %s2698_s5  ;;  %v316_v32 = vsel %vm315_vm8, %v310_v11, %v312_v23 }
  0xab   : > { %2231 = vrot.lane.b32.xlu0 %v2230_v57, %s2698_s5 }
  0xac   : > { %v314_v24 = vpop.permute.xlu0 %313  ;;  %v2197_v38 = vpop.permute.xlu1 %2196 }
  0xad   : > { %2236 = vrot.lane.b32.xlu1 %v2235_v61, %s2698_s5  ;;  %v317_v28 = vsel %vm315_vm8, %v312_v23, %v314_v24  ;;  %v2199_v43 = vunpack.i.h.bf16 %v2197_v38  ;;  %v2198_v44 = vunpack.i.l.bf16 %v2197_v38 }
  0xaf   : > { %2246 = vrot.lane.b32.xlu0 %v2245_v2, %s2698_s5  ;;  %v393_v52 = vsel %vm391_vm10, %v2198_v44, %v2199_v43 }
  0xb1   : > { %2241 = vrot.lane.b32.xlu1 %v2240_v10, %s2698_s5 }
  0xb3   : > { %2261 = vrot.lane.b32.xlu0 %v2260_v14, %s2698_s5 }
  0xb5   : > { %2251 = vrot.lane.b32.xlu1 %v2250_v18, %s2698_s5 }
  0xb7   : > { %2271 = vrot.lane.b32.xlu0 %v2270_v22, %s2698_s5 }
  0xb9   : > { %2256 = vrot.lane.b32.xlu1 %v2255_v25, %s2698_s5 }
  0xbb   : > { %387 = vrot.lane.b32.xlu0 %v317_v28, %s2698_s5 }
  0xbd   : > { %2266 = vrot.lane.b32.xlu1 %v2265_v29, %s2698_s5 }
  0xbf   : > { %389 = vrot.lane.b32.xlu0 %v314_v24, %s2698_s5 }
  0xc1   : > { %385 = vrot.lane.b32.xlu1 %v316_v32, %s2698_s5 }
  0xc3   : > { %601 = vperm.xlu0 %2276, %v591_v33  }
  0xc5   : > { %383 = vrot.lane.b32.xlu1 %v310_v11, %s2698_s5 }
  0xc9   : > { %594 = vperm.xlu1 %2275, %v591_v33  }
  0xcd   : > { %2277 = vset.pattern.permute.xlu1 %v2703_v34 }
  0xce   : > { %611 = vperm.xlu1 %2277, %v591_v33  }
  0xd2   : > { %2278 = vset.pattern.permute.xlu1 %v2704_v35 }
  0xd3   : > { %618 = vperm.xlu1 %2278, %v591_v33  }
  0xd7   : > { %2409 = vset.pattern.permute.xlu1 %v2701_v30 }
 0x107   : > { %v2202_v36 = vpop.permute.xlu0 %2201 }
 0x108   : > { %v2203_v45 = vunpack.i.l.bf16 %v2202_v36  ;;  %v2204_v48 = vunpack.i.h.bf16 %v2202_v36 }
 0x10a   : > { %v394_v53 = vsel %vm391_vm10, %v2199_v43, %v2203_v45 }
 0x10b   : > { %v2207_v37 = vpop.permute.xlu0 %2206 }
 0x10c   : > { %v2209_v4 = vunpack.i.h.bf16 %v2207_v37  ;;  %v2208_v5 = vunpack.i.l.bf16 %v2207_v37 }
 0x111   : > { %v2867_v39 = vpop.permute.xlu0 %2216 }
 0x112   : > { %v2219_v27 = vunpack.i.h.bf16 %v2867_v39  ;;  %v2218_v28 = vunpack.i.l.bf16 %v2867_v39 }
 0x113   : > { %v2869_v41 = vpop.permute.xlu1 %2211 }
 0x114   : > { %v2214_v26 = vunpack.i.h.bf16 %v2869_v41  ;;  %v2213_v33 = vunpack.i.l.bf16 %v2869_v41 }
 0x119   : > { %v2871_v42 = vpop.permute.xlu0 %2226 }
 0x11a   : > { %v2229_v36 = vunpack.i.h.bf16 %v2871_v42 }
 0x11b   : > { %v2873_v46 = vpop.permute.xlu1 %2221 }
 0x11c   : > { %v2224_v41 = vunpack.i.h.bf16 %v2873_v46 }
 0x11d   : > { %v2232_v47 = vpop.permute.xlu0 %2231 }
 0x11e   : > { %v2234_v49 = vunpack.i.h.bf16 %v2232_v47  ;;  %v2233_v50 = vunpack.i.l.bf16 %v2232_v47 }
 0x11f   : > { %v2237_v51 = vpop.permute.xlu1 %2236 }
 0x120   : > { %v2239_v54 = vunpack.i.h.bf16 %v2237_v51  ;;  %v2238_v55 = vunpack.i.l.bf16 %v2237_v51  ;;  %v396_v56 = vsel %vm391_vm10, %v2233_v50, %v2234_v49  ;;  %v397_v57 = vsel %vm391_vm10, %v2234_v49, %v2204_v48 }
 0x121   : > { %v2247_v58 = vpop.permute.xlu0 %2246  ;;  %v2008_v59 = vpack.c.bf16 %v396_v56, %v393_v52  ;;  %v2025_v60 = vpack.c.bf16 %v397_v57, %v394_v53  ;;  %v2228_v56 = vunpack.i.l.bf16 %v2871_v42  ;;  %v2223_v57 = vunpack.i.l.bf16 %v2873_v46 }
 0x122   : > { %v2249_v61 = vunpack.i.h.bf16 %v2247_v58  ;;  %v2248_v62 = vunpack.i.l.bf16 %v2247_v58  ;;  %v392_v63 = vsel %vm391_vm10, %v2238_v55, %v2198_v44  ;;  %v395_v0 = vsel %vm391_vm10, %v2239_v54, %v2233_v50 }
 0x123   : > { %2009 = vmatprep.subr.bf16.mxu0 %v2008_v59  ;;  %2026 = vmatpush3.bf16.msra.mxu1 %v2025_v60  ;;  %v2242_v2 = vpop.permute.xlu1 %2241  ;;  %v2010_v3 = vpack.c.bf16 %v395_v0, %v392_v63 }
 0x124   : > { %v2244_v6 = vunpack.i.h.bf16 %v2242_v2  ;;  %v2243_v10 = vunpack.i.l.bf16 %v2242_v2  ;;  %2027 = vmatprep.subr.bf16.mxu1 %v2699_v40  ;;  %v402_v13 = vsel %vm391_vm10, %v2248_v62, %v2249_v61  ;;  %v403_v15 = vsel %vm391_vm10, %v2249_v61, %v2209_v4 }
 0x125   : > { %v2262_v11 = vpop.permute.xlu0 %2261  ;;  %2011 = vmatpush1.bf16.msra.mxu0 %v2010_v3 }
 0x126   : > { %v399_v12 = vsel %vm391_vm10, %v2243_v10, %v2244_v6  ;;  %v400_v14 = vsel %vm391_vm10, %v2244_v6, %v2208_v5  ;;  %v2264_v21 = vunpack.i.h.bf16 %v2262_v11  ;;  %v2263_v22 = vunpack.i.l.bf16 %v2262_v11  ;;  %v318_v11 = vld [vmem:[%s3311_s2] sm:$0xff] }
 0x127   : > { %v2252_v16 = vpop.permute.xlu1 %2251  ;;  %v2012_v17 = vpack.c.bf16 %v402_v13, %v399_v12  ;;  %v2028_v18 = vpack.c.bf16 %v403_v15, %v400_v14 }
 0x128   : > { %v2254_v19 = vunpack.i.h.bf16 %v2252_v16  ;;  %v2253_v20 = vunpack.i.l.bf16 %v2252_v16  ;;  %v408_v45 = vsel %vm391_vm10, %v2263_v22, %v2264_v21  ;;  %v409_v47 = vsel %vm391_vm10, %v2264_v21, %v2219_v27 }
 0x129   : > { %v2272_v23 = vpop.permute.xlu0 %2271  ;;  %2013 = vmatprep.subr.bf16.mxu0 %v2012_v17  ;;  %2029 = vmatpush3.bf16.msra.mxu1 %v2028_v18  ;;  %v407_v50 = vsel %vm391_vm10, %v2214_v26, %v2263_v22 }
 0x12a   : > { %v398_v24 = vsel %vm391_vm10, %v2253_v20, %v2243_v10  ;;  %v401_v25 = vsel %vm391_vm10, %v2254_v19, %v2248_v62  ;;  %2030 = vmatprep.subr.bf16.mxu1 %v2699_v40  ;;  %v2274_v43 = vunpack.i.h.bf16 %v2272_v23  ;;  %v2273_v44 = vunpack.i.l.bf16 %v2272_v23 }
 0x12b   : > { %v2257_v29 = vpop.permute.xlu1 %2256  ;;  %v2014_v32 = vpack.c.bf16 %v401_v25, %v398_v24 }
 0x12c   : > { %v2259_v37 = vunpack.i.h.bf16 %v2257_v29  ;;  %v2258_v38 = vunpack.i.l.bf16 %v2257_v29  ;;  %v414_v60 = vsel %vm391_vm10, %v2273_v44, %v2274_v43  ;;  %v415_v61 = vsel %vm391_vm10, %v2274_v43, %v2229_v36 }
 0x12d   : > { %2015 = vmatpush1.bf16.msra.mxu0 %v2014_v32  ;;  %v388_v52 = vpop.permute.xlu0 %387  ;;  %v413_v62 = vsel %vm391_vm10, %v2224_v41, %v2273_v44 }
 0x12e   : > { %v405_v48 = vsel %vm391_vm10, %v2258_v38, %v2259_v37  ;;  %v406_v49 = vsel %vm391_vm10, %v2259_v37, %v2218_v28  ;;  %v404_v39 = vsel %vm391_vm10, %v2213_v33, %v2258_v38 }
 0x12f   : > { %v2267_v51 = vpop.permute.xlu1 %2266  ;;  %v2016_v53 = vpack.c.bf16 %v408_v45, %v405_v48  ;;  %v2031_v54 = vpack.c.bf16 %v409_v47, %v406_v49  ;;  %v2018_v55 = vpack.c.bf16 %v407_v50, %v404_v39 }
 0x130   : > { %v2269_v58 = vunpack.i.h.bf16 %v2267_v51  ;;  %v2268_v59 = vunpack.i.l.bf16 %v2267_v51 }
 0x131   : > { %2017 = vmatprep.subr.bf16.mxu0 %v2016_v53  ;;  %2032 = vmatpush3.bf16.msra.mxu1 %v2031_v54  ;;  %v390_v5 = vpop.permute.xlu0 %389 }
 0x132   : > { %2019 = vmatpush1.bf16.msra.mxu0 %v2018_v55  ;;  %2033 = vmatprep.subr.bf16.mxu1 %v2699_v40  ;;  %v411_v63 = vsel %vm391_vm10, %v2268_v59, %v2269_v58  ;;  %v412_v0 = vsel %vm391_vm10, %v2269_v58, %v2228_v56  ;;  %v410_v42 = vsel %vm391_vm10, %v2223_v57, %v2268_v59 }
 0x133   : > { %v386_v46 = vpop.permute.xlu1 %385  ;;  %v2020_v2 = vpack.c.bf16 %v414_v60, %v411_v63  ;;  %v2034_v3 = vpack.c.bf16 %v415_v61, %v412_v0  ;;  %v2022_v4 = vpack.c.bf16 %v413_v62, %v410_v42  ;;  %v418_v12 = vsel %vm391_vm10, %v388_v52, %v390_v5 }
 0x134   : > { %v417_v6 = vsel %vm391_vm10, %v386_v46, %v388_v52 }
 0x135   : > { %2021 = vmatprep.subr.bf16.mxu0 %v2020_v2  ;;  %2035 = vmatpush3.bf16.msra.mxu1 %v2034_v3 }
 0x136   : > { %2023 = vmatpush1.bf16.msra.mxu0 %v2022_v4  ;;  %1940 = vmatprep.subr.mxu1 %v2689_v1 }
 0x137   : > { %v384_v10 = vpop.permute.xlu1 %383  ;;  %466 = vmatprep.subr.mxu0 %v417_v6 }
 0x138   : > { %v416_v13 = vsel %vm391_vm10, %v384_v10, %v386_v46 }
 0x139   : > { %1941 = vmatpush3.msra.mxu1 %v418_v12 }
 0x13a   : > { %467 = vmatpush1.msra.mxu0 %v416_v13  ;;  %1943 = vmatmul.mubr.msk.f32.vlgmr.msra.gmra.mrb[0].mxu1 %vm446_vm11, %v318_v11 }
 0x13b   : > { %1868 = vmatmul.mubr.msk.f32.vlgmr.msra.gmra.mrb[0].mxu0 %vm446_vm11, %v318_v11  ;;  %2052 = vmatprep.subr.bf16.mxu1 %v2699_v40 }
 0x13c   : > { %1963 = vmatprep.mubr.msk.f32.mxu1 %vm2700_vm9, %v2689_v1  ;;  %906 = vmatprep.mubr.f32.mxu0 %v2689_v1 }
 0x142   : > { %v602_v15 = vpop.permute.xlu0 %601 }
 0x148   : > { %v595_v14 = vpop.permute.xlu1 %594 }
 0x14d   : > { %v612_v17 = vpop.permute.xlu1 %611 }
 0x152   : > { %v619_v29 = vpop.permute.xlu1 %618 }
 0x20d   : > { %v587_v16 = vpop.f32.mrb[0].mxu1 }
 0x20e   : > { %v599_v18 = vmul.f32 %v595_v14, %v587_v16  ;;  %v516_v19 = vpop.f32.mrb[0].mxu0  ;;  %v1944_v20 = vpop.f32.mrb[1].mxu1 }
 0x20f   : > { %v597_v21 = vmul.f32 %v595_v14, %v516_v19  ;;  %v518_v22 = vpop.f32.mrb[1].mxu0 }
 0x210   : > { %v606_v23 = vadd.f32 %v602_v15, %v599_v18  ;;  %v598_v24 = vmul.f32 %v595_v14, %v518_v22 }
 0x211   : > { %v604_v25 = vadd.f32 %v602_v15, %v597_v21 }
 0x212   : > { %v609_v26 = vmax.f32 %v606_v23, 0.0  ;;  %v605_v27 = vadd.f32 %v602_v15, %v598_v24 }
 0x213   : > { %v607_v28 = vmax.f32 %v604_v25, 0.0 }
 0x214   : > { %v608_v32 = vmax.f32 %v605_v27, 0.0  ;;  %v616_v33 = vmul.f32 %v612_v17, %v609_v26 }
 0x215   : > { %v614_v36 = vmul.f32 %v612_v17, %v607_v28 }
 0x216   : > { %v615_v37 = vmul.f32 %v612_v17, %v608_v32  ;;  %v623_v38 = vadd.f32 %v619_v29, %v616_v33 }
 0x217   : > { %v621_v43 = vadd.f32 %v619_v29, %v614_v36 }
 0x218   : > { %v622_v44 = vadd.f32 %v619_v29, %v615_v37  ;;  %v626_v45 = vmul.f32 %v623_v38, %v2756_v9 }
 0x219   : > { %v624_v47 = vmul.f32 %v621_v43, %v2752_v7 }
 0x21a   : > { %v625_v48 = vmul.f32 %v622_v44, %v2754_v8  ;;  %629 = vst.msk [vmem:[#allocation2 + $0x18] sm:$0xff] %vm227_vm0, %v626_v45 }
 0x21c   : > { %v2294_v49 = vpack.i.bf16 %v625_v48, %v624_v47 }
 0x21e   : > { %2295 = vrot.lane.b32.xlu0 %v2294_v49, %s2691_s24 }
 0x221   : > { %v633_v39 = vld [vmem:[#allocation2 + $0x18] sm:$0xff] }
 0x222   : > { %v2279_v50 = vpack.i.bf16 %v2689_v1, %v633_v39  ;;  %2300 = vrot.lane.b32.xlu0 %v2294_v49, %s2690_s23 }
 0x224   : > { %2280 = vrot.lane.b32.xlu1 %v2279_v50, %s2691_s24 }
 0x226   : > { %2305 = vrot.lane.b32.xlu0 %v2294_v49, %s2692_s25 }
 0x228   : > { %2285 = vrot.lane.b32.xlu1 %v2279_v50, %s2690_s23 }
 0x22a   : > { %2310 = vrot.lane.b32.xlu0 %v2294_v49, %s2693_s26 }
 0x22c   : > { %2290 = vrot.lane.b32.xlu1 %v2279_v50, %s2692_s25 }
 0x22e   : > { %2315 = vrot.lane.b32.xlu0 %v2294_v49, %s2694_s27 }
 0x230   : > { %675 = vrot.lane.b32.xlu1 %v633_v39, %s2693_s26 }
 0x232   : > { %2320 = vrot.lane.b32.xlu0 %v2294_v49, %s2695_s28 }
 0x234   : > { %683 = vrot.lane.b32.xlu1 %v633_v39, %s2694_s27 }
 0x236   : > { %2325 = vrot.lane.b32.xlu0 %v2294_v49, %s2696_s29 }
 0x238   : > { %691 = vrot.lane.b32.xlu1 %v633_v39, %s2695_s28 }
 0x23a   : > { %703 = vrot.lane.b32.xlu0 %v624_v47, %s2697_s30 }
 0x23c   : > { %699 = vrot.lane.b32.xlu1 %v633_v39, %s2696_s29 }
 0x23e   : > { %707 = vrot.lane.b32.xlu0 %v633_v39, %s2697_s30 }
 0x240   : > { %705 = vrot.lane.b32.xlu1 %v625_v48, %s2697_s30 }
 0x244   : > { %2330 = vrot.lane.b32.xlu1 %v2294_v49, %s2698_s5 }
 0x290   : > { %v2296_v41 = vpop.permute.xlu0 %2295 }
 0x291   : > { %v2297_v12 = vunpack.i.l.bf16 %v2296_v41  ;;  %v2298_v17 = vunpack.i.h.bf16 %v2296_v41 }
 0x293   : > { %v647_v28 = vsel %vm245_vm1, %v2297_v12, %v2298_v17 }
 0x294   : > { %v2301_v51 = vpop.permute.xlu0 %2300 }
 0x295   : > { %v2302_v23 = vunpack.i.l.bf16 %v2301_v51  ;;  %v2303_v26 = vunpack.i.h.bf16 %v2301_v51 }
 0x296   : > { %v2281_v52 = vpop.permute.xlu1 %2280 }
 0x297   : > { %v2282_v53 = vunpack.i.l.bf16 %v2281_v52  ;;  %v2283_v5 = vunpack.i.h.bf16 %v2281_v52  ;;  %v658_v44 = vsel %vm257_vm3, %v2302_v23, %v2303_v26 }
 0x298   : > { %v2306_v54 = vpop.permute.xlu0 %2305 }
 0x299   : > { %v2334_v55 = vpack.i.bf16 %v2282_v53, %v633_v39  ;;  %v646_v16 = vsel %vm245_vm1, %v2283_v5, %v2297_v12  ;;  %v2307_v19 = vunpack.i.l.bf16 %v2306_v54  ;;  %v648_v24 = vsel %vm245_vm1, %v2298_v17, %v2282_v53 }
 0x29a   : > { %v2286_v56 = vpop.permute.xlu1 %2285  ;;  %v2364_v22 = vpack.i.bf16 %v646_v16, %v2689_v1  ;;  %v2308_v27 = vunpack.i.h.bf16 %v2306_v54  ;;  %v2374_v32 = vpack.i.bf16 %v648_v24, %v647_v28 }
 0x29b   : > { %2335 = vrot.lane.b32.xlu0 %v2334_v55, %s2698_s5  ;;  %v2287_v59 = vunpack.i.l.bf16 %v2286_v56  ;;  %v2288_v18 = vunpack.i.h.bf16 %v2286_v56 }
 0x29c   : > { %v2311_v57 = vpop.permute.xlu0 %2310  ;;  %v669_v43 = vsel %vm269_vm2, %v2307_v19, %v2308_v27 }
 0x29d   : > { %v2312_v63 = vunpack.i.l.bf16 %v2311_v57  ;;  %v657_v29 = vsel %vm257_vm3, %v2288_v18, %v2302_v23  ;;  %v659_v1 = vsel %vm257_vm3, %v2303_v26, %v2287_v59  ;;  %v2313_v37 = vunpack.i.h.bf16 %v2311_v57 }
 0x29e   : > { %v2291_v58 = vpop.permute.xlu1 %2290  ;;  %v2379_v47 = vpack.i.bf16 %v659_v1, %v658_v44 }
 0x29f   : > { %v2292_v60 = vunpack.i.l.bf16 %v2291_v58  ;;  %v2293_v15 = vunpack.i.h.bf16 %v2291_v58  ;;  %v677_v51 = vsel %vm279_vm6, %v2312_v63, %v2313_v37 }
 0x2a0   : > { %v2316_v61 = vpop.permute.xlu0 %2315 }
 0x2a1   : > { %v2339_v62 = vpack.i.bf16 %v2292_v60, %v2287_v59  ;;  %v2317_v0 = vunpack.i.l.bf16 %v2316_v61  ;;  %v668_v25 = vsel %vm269_vm2, %v2293_v15, %v2307_v19  ;;  %v670_v36 = vsel %vm269_vm2, %v2308_v27, %v2292_v60 }
 0x2a2   : > { %v676_v42 = vpop.permute.xlu1 %675  ;;  %v2369_v33 = vpack.i.bf16 %v668_v25, %v657_v29  ;;  %v2318_v38 = vunpack.i.h.bf16 %v2316_v61  ;;  %v2384_v45 = vpack.i.bf16 %v670_v36, %v669_v43 }
 0x2a3   : > { %2340 = vrot.lane.b32.xlu0 %v2339_v62, %s2698_s5  ;;  %v2354_v46 = vpack.i.bf16 %v2317_v0, %v2312_v63  ;;  %v678_v49 = vsel %vm279_vm6, %v2313_v37, %v676_v42 }
 0x2a4   : > { %v2321_v2 = vpop.permute.xlu0 %2320  ;;  %v685_v41 = vsel %vm288_vm4, %v2317_v0, %v2318_v38  ;;  %v2389_v53 = vpack.i.bf16 %v678_v49, %v677_v51 }
 0x2a5   : > { %2355 = vrot.lane.b32.xlu1 %v2354_v46, %s2698_s5  ;;  %v2322_v10 = vunpack.i.l.bf16 %v2321_v2  ;;  %v2323_v39 = vunpack.i.h.bf16 %v2321_v2 }
 0x2a6   : > { %v684_v3 = vpop.permute.xlu1 %683 }
 0x2a7   : > { %v2344_v4 = vpack.i.bf16 %v684_v3, %v676_v42  ;;  %v686_v48 = vsel %vm288_vm4, %v2318_v38, %v684_v3  ;;  %v693_v58 = vsel %vm297_vm7, %v2322_v10, %v2323_v39  ;;  %v1873_v42 = vld [vmem:[%s3312_s3 + $0x8] sm:$0xff] }
 0x2a8   : > { %v2326_v6 = vpop.permute.xlu0 %2325  ;;  %v2394_v52 = vpack.i.bf16 %v686_v48, %v685_v41 }
 0x2a9   : > { %2345 = vrot.lane.b32.xlu0 %v2344_v4, %s2698_s5  ;;  %v2327_v11 = vunpack.i.l.bf16 %v2326_v6  ;;  %v2328_v50 = vunpack.i.h.bf16 %v2326_v6 }
 0x2aa   : > { %v692_v13 = vpop.permute.xlu1 %691 }
 0x2ab   : > { %v2359_v14 = vpack.i.bf16 %v2327_v11, %v2322_v10  ;;  %v694_v55 = vsel %vm297_vm7, %v2323_v39, %v692_v13  ;;  %v701_v57 = vsel %vm306_vm5, %v2327_v11, %v2328_v50 }
 0x2ac   : > { %v704_v56 = vpop.permute.xlu0 %703  ;;  %v2399_v60 = vpack.i.bf16 %v694_v55, %v693_v58 }
 0x2ad   : > { %2360 = vrot.lane.b32.xlu1 %v2359_v14, %s2698_s5 }
 0x2ae   : > { %v700_v20 = vpop.permute.xlu1 %699 }
 0x2af   : > { %v2349_v21 = vpack.i.bf16 %v700_v20, %v692_v13  ;;  %v702_v54 = vsel %vm306_vm5, %v2328_v50, %v700_v20 }
 0x2b0   : > { %v2404_v59 = vpack.i.bf16 %v702_v54, %v701_v57  ;;  %v708_v62 = vpop.permute.xlu0 %707 }
 0x2b1   : > { %2350 = vrot.lane.b32.xlu0 %v2349_v21, %s2698_s5  ;;  %2365 = vrot.lane.b32.xlu1 %v2364_v22, %s2698_s5 }
 0x2b2   : > { %v706_v61 = vpop.permute.xlu1 %705 }
 0x2b3   : > { %v710_v63 = vsel %vm315_vm8, %v706_v61, %v708_v62  ;;  %v709_v0 = vsel %vm315_vm8, %v704_v56, %v706_v61 }
 0x2b5   : > { %2375 = vrot.lane.b32.xlu0 %v2374_v32, %s2698_s5  ;;  %2370 = vrot.lane.b32.xlu1 %v2369_v33, %s2698_s5 }
 0x2b6   : > { %v2331_v46 = vpop.permute.xlu1 %2330 }
 0x2b7   : > { %v2333_v10 = vunpack.i.h.bf16 %v2331_v46  ;;  %v2332_v11 = vunpack.i.l.bf16 %v2331_v46 }
 0x2b9   : > { %2385 = vrot.lane.b32.xlu0 %v2384_v45, %s2698_s5  ;;  %2380 = vrot.lane.b32.xlu1 %v2379_v47, %s2698_s5 }
 0x2bd   : > { %2395 = vrot.lane.b32.xlu0 %v2394_v52, %s2698_s5  ;;  %2390 = vrot.lane.b32.xlu1 %v2389_v53, %s2698_s5 }
 0x2c1   : > { %2405 = vrot.lane.b32.xlu0 %v2404_v59, %s2698_s5  ;;  %2400 = vrot.lane.b32.xlu1 %v2399_v60, %s2698_s5 }
 0x2c5   : > { %781 = vrot.lane.b32.xlu0 %v710_v63, %s2698_s5  ;;  %779 = vrot.lane.b32.xlu1 %v709_v0, %s2698_s5 }
 0x2c9   : > { %783 = vrot.lane.b32.xlu0 %v708_v62, %s2698_s5  ;;  %777 = vrot.lane.b32.xlu1 %v704_v56, %s2698_s5 }
 0x2cd   : > { %994 = vperm.xlu0 %2276, %v1873_v42   ;;  %987 = vperm.xlu1 %2409, %v1873_v42  }
 0x2d1   : > { %2410 = vset.pattern.permute.xlu1 %v2703_v34  ;;  %2411 = vset.pattern.permute.xlu0 %v2704_v35 }
 0x2d2   : > { %1004 = vperm.xlu1 %2410, %v1873_v42   ;;  %1011 = vperm.xlu0 %2411, %v1873_v42  }
 0x2d6   : > { %2542 = vset.pattern.permute.xlu1 %v2701_v30  ;;  %2543 = vset.pattern.permute.xlu0 %v2702_v31  ;;  %v786_v31 = vsel %vm391_vm10, %v2332_v11, %v2333_v10 }
 0x30d   : > { %v2336_v2 = vpop.permute.xlu0 %2335 }
 0x30e   : > { %v2337_v14 = vunpack.i.l.bf16 %v2336_v2  ;;  %v2338_v16 = vunpack.i.h.bf16 %v2336_v2 }
 0x310   : > { %v787_v19 = vsel %vm391_vm10, %v2333_v10, %v2337_v14 }
 0x315   : > { %v2341_v3 = vpop.permute.xlu0 %2340 }
 0x316   : > { %v2343_v23 = vunpack.i.h.bf16 %v2341_v3  ;;  %v2342_v24 = vunpack.i.l.bf16 %v2341_v3 }
 0x317   : > { %v2992_v4 = vpop.permute.xlu1 %2355 }
 0x318   : > { %v2358_v25 = vunpack.i.h.bf16 %v2992_v4  ;;  %v2357_v50 = vunpack.i.l.bf16 %v2992_v4 }
 0x31b   : > { %v2994_v5 = vpop.permute.xlu0 %2345 }
 0x31c   : > { %v2348_v49 = vunpack.i.h.bf16 %v2994_v5  ;;  %v2347_v39 = vunpack.i.l.bf16 %v2994_v5 }
 0x31f   : > { %v2996_v6 = vpop.permute.xlu1 %2360 }
 0x320   : > { %v2363_v41 = vunpack.i.h.bf16 %v2996_v6  ;;  %v2362_v2 = vunpack.i.l.bf16 %v2996_v6 }
 0x323   : > { %v2998_v12 = vpop.permute.xlu0 %2350  ;;  %v2366_v13 = vpop.permute.xlu1 %2365 }
 0x324   : > { %v2367_v15 = vunpack.i.l.bf16 %v2366_v13  ;;  %v2368_v22 = vunpack.i.h.bf16 %v2366_v13  ;;  %v2353_v42 = vunpack.i.h.bf16 %v2998_v12  ;;  %v2352_v46 = vunpack.i.l.bf16 %v2998_v12 }
 0x326   : > { %v785_v26 = vsel %vm391_vm10, %v2367_v15, %v2332_v11 }
 0x327   : > { %v2376_v17 = vpop.permute.xlu0 %2375  ;;  %v2371_v18 = vpop.permute.xlu1 %2370 }
 0x328   : > { %v2378_v20 = vunpack.i.h.bf16 %v2376_v17  ;;  %v2377_v21 = vunpack.i.l.bf16 %v2376_v17  ;;  %v2373_v32 = vunpack.i.h.bf16 %v2371_v18  ;;  %v2372_v37 = vunpack.i.l.bf16 %v2371_v18 }
 0x32a   : > { %v790_v27 = vsel %vm391_vm10, %v2378_v20, %v2338_v16  ;;  %v788_v28 = vsel %vm391_vm10, %v2368_v22, %v2377_v21  ;;  %v789_v29 = vsel %vm391_vm10, %v2377_v21, %v2378_v20 }
 0x32b   : > { %v2053_v33 = vpack.c.bf16 %v790_v27, %v787_v19  ;;  %v2386_v36 = vpop.permute.xlu0 %2385  ;;  %v2036_v1 = vpack.c.bf16 %v789_v29, %v786_v31  ;;  %v2038_v38 = vpack.c.bf16 %v788_v28, %v785_v26  ;;  %v2381_v43 = vpop.permute.xlu1 %2380 }
 0x32c   : > { %v2388_v44 = vunpack.i.h.bf16 %v2386_v36  ;;  %v2387_v45 = vunpack.i.l.bf16 %v2386_v36  ;;  %v2383_v47 = vunpack.i.h.bf16 %v2381_v43  ;;  %v2382_v48 = vunpack.i.l.bf16 %v2381_v43  ;;  %v3035_v36 = vld [vmem:[#allocation2] sm:$0xff] }
 0x32d   : > { %2037 = vmatprep.subr.bf16.mxu0 %v2036_v1  ;;  %2054 = vmatpush3.bf16.msra.mxu1 %v2053_v33 }
 0x32e   : > { %v796_v51 = vsel %vm391_vm10, %v2388_v44, %v2343_v23  ;;  %v794_v52 = vsel %vm391_vm10, %v2373_v32, %v2387_v45  ;;  %2039 = vmatpush1.bf16.msra.mxu0 %v2038_v38  ;;  %v793_v53 = vsel %vm391_vm10, %v2383_v47, %v2342_v24  ;;  %v791_v54 = vsel %vm391_vm10, %v2372_v37, %v2382_v48  ;;  %v1870_v38 = vld [vmem:[%s3311_s2 + $0x8] sm:$0xff] }
 0x32f   : > { %v2396_v55 = vpop.permute.xlu0 %2395  ;;  %v2056_v56 = vpack.c.bf16 %v796_v51, %v793_v53  ;;  %v2042_v57 = vpack.c.bf16 %v794_v52, %v791_v54  ;;  %v2391_v58 = vpop.permute.xlu1 %2390  ;;  %2055 = vmatprep.subr.bf16.mxu1 %v2699_v40  ;;  %v792_v59 = vsel %vm391_vm10, %v2382_v48, %v2383_v47  ;;  %v795_v60 = vsel %vm391_vm10, %v2387_v45, %v2388_v44 }
 0x330   : > { %v2398_v61 = vunpack.i.h.bf16 %v2396_v55  ;;  %v2397_v62 = vunpack.i.l.bf16 %v2396_v55  ;;  %v2393_v63 = vunpack.i.h.bf16 %v2391_v58  ;;  %v2392_v0 = vunpack.i.l.bf16 %v2391_v58 }
 0x331   : > { %v2040_v3 = vpack.c.bf16 %v795_v60, %v792_v59  ;;  %2057 = vmatpush3.bf16.msra.mxu1 %v2056_v56 }
 0x332   : > { %v802_v4 = vsel %vm391_vm10, %v2398_v61, %v2348_v49  ;;  %v800_v5 = vsel %vm391_vm10, %v2358_v25, %v2397_v62  ;;  %v799_v10 = vsel %vm391_vm10, %v2393_v63, %v2347_v39  ;;  %v797_v11 = vsel %vm391_vm10, %v2357_v50, %v2392_v0  ;;  %2058 = vmatprep.subr.bf16.mxu1 %v2699_v40 }
 0x333   : > { %v2406_v13 = vpop.permute.xlu0 %2405  ;;  %v2059_v14 = vpack.c.bf16 %v802_v4, %v799_v10  ;;  %v2046_v15 = vpack.c.bf16 %v800_v5, %v797_v11  ;;  %2041 = vmatprep.subr.bf16.mxu0 %v2040_v3  ;;  %v2401_v16 = vpop.permute.xlu1 %2400  ;;  %v798_v12 = vsel %vm391_vm10, %v2392_v0, %v2393_v63  ;;  %v801_v6 = vsel %vm391_vm10, %v2397_v62, %v2398_v61 }
 0x334   : > { %v2408_v17 = vunpack.i.h.bf16 %v2406_v13  ;;  %v2407_v31 = vunpack.i.l.bf16 %v2406_v13  ;;  %2043 = vmatpush1.bf16.msra.mxu0 %v2042_v57  ;;  %v2403_v18 = vunpack.i.h.bf16 %v2401_v16  ;;  %v2402_v19 = vunpack.i.l.bf16 %v2401_v16 }
 0x335   : > { %v2044_v20 = vpack.c.bf16 %v801_v6, %v798_v12  ;;  %2060 = vmatpush3.bf16.msra.mxu1 %v2059_v14 }
 0x336   : > { %v808_v21 = vsel %vm391_vm10, %v2408_v17, %v2353_v42  ;;  %v806_v22 = vsel %vm391_vm10, %v2363_v41, %v2407_v31  ;;  %v805_v23 = vsel %vm391_vm10, %v2403_v18, %v2352_v46  ;;  %v803_v24 = vsel %vm391_vm10, %v2362_v2, %v2402_v19  ;;  %2061 = vmatprep.subr.bf16.mxu1 %v2699_v40 }
 0x337   : > { %v782_v25 = vpop.permute.xlu0 %781  ;;  %v2062_v26 = vpack.c.bf16 %v808_v21, %v805_v23  ;;  %2045 = vmatprep.subr.bf16.mxu0 %v2044_v20  ;;  %v780_v27 = vpop.permute.xlu1 %779  ;;  %v804_v28 = vsel %vm391_vm10, %v2402_v19, %v2403_v18  ;;  %v807_v29 = vsel %vm391_vm10, %v2407_v31, %v2408_v17  ;;  %v2050_v32 = vpack.c.bf16 %v806_v22, %v803_v24 }
 0x338   : > { %2047 = vmatpush1.bf16.msra.mxu0 %v2046_v15  ;;  %v2048_v33 = vpack.c.bf16 %v807_v29, %v804_v28  ;;  %v810_v44 = vsel %vm391_vm10, %v780_v27, %v782_v25 }
 0x339   : > { %2063 = vmatpush3.bf16.msra.mxu1 %v2062_v26 }
 0x33a   : > { %2049 = vmatprep.subr.bf16.mxu0 %v2048_v33  ;;  %1961 = vmatprep.subr.mxu1 %v3035_v36 }
 0x33b   : > { %v784_v1 = vpop.permute.xlu0 %783  ;;  %v778_v37 = vpop.permute.xlu1 %777 }
 0x33c   : > { %v811_v43 = vsel %vm391_vm10, %v782_v25, %v784_v1  ;;  %2051 = vmatpush1.bf16.msra.mxu0 %v2050_v32  ;;  %v809_v45 = vsel %vm391_vm10, %v778_v37, %v780_v27 }
 0x33d   : > { %858 = vmatprep.subr.mxu0 %v810_v44  ;;  %1962 = vmatpush3.msra.mxu1 %v811_v43 }
 0x33e   : > { %1964 = vmatmul.mubr.msk.f32.vlgmr.msra.gmra.mrb[2].mxu1 %vm446_vm11, %v1870_v38  ;;  %2080 = vmatprep.subr.bf16.mxu1 %v2699_v40 }
 0x33f   : > { %1984 = vmatprep.mubr.msk.f32.mxu1 %vm2700_vm9, %v3035_v36 }
 0x340   : > { %859 = vmatpush1.msra.mxu0 %v809_v45 }
 0x341   : > { %1871 = vmatmul.mubr.msk.f32.vlgmr.msra.gmra.mrb[2].mxu0 %vm446_vm11, %v1870_v38 }
 0x342   : > { %1299 = vmatprep.mubr.f32.mxu0 %v3035_v36 }
 0x34c   : > { %v988_v47 = vpop.permute.xlu1 %987  ;;  %v995_v50 = vpop.permute.xlu0 %994 }
 0x351   : > { %v1005_v54 = vpop.permute.xlu1 %1004  ;;  %v1012_v58 = vpop.permute.xlu0 %1011 }
 0x411   : > { %v979_v48 = vpop.f32.mrb[2].mxu1 }
 0x412   : > { %v992_v49 = vmul.f32 %v988_v47, %v979_v48  ;;  %v1965_v39 = vpop.f32.mrb[3].mxu1 }
 0x414   : > { %v999_v41 = vadd.f32 %v995_v50, %v992_v49  ;;  %v908_v51 = vpop.f32.mrb[2].mxu0 }
 0x415   : > { %v990_v52 = vmul.f32 %v988_v47, %v908_v51  ;;  %v910_v53 = vpop.f32.mrb[3].mxu0 }
 0x416   : > { %v1002_v55 = vmax.f32 %v999_v41, 0.0  ;;  %v991_v56 = vmul.f32 %v988_v47, %v910_v53 }
 0x417   : > { %v997_v57 = vadd.f32 %v995_v50, %v990_v52 }
 0x418   : > { %v998_v59 = vadd.f32 %v995_v50, %v991_v56  ;;  %v1009_v60 = vmul.f32 %v1005_v54, %v1002_v55 }
 0x419   : > { %v1000_v61 = vmax.f32 %v997_v57, 0.0 }
 0x41a   : > { %v1001_v62 = vmax.f32 %v998_v59, 0.0  ;;  %v1016_v63 = vadd.f32 %v1012_v58, %v1009_v60 }
 0x41b   : > { %v1007_v0 = vmul.f32 %v1005_v54, %v1000_v61 }
 0x41c   : > { %v1008_v42 = vmul.f32 %v1005_v54, %v1001_v62  ;;  %v1019_v46 = vmul.f32 %v1016_v63, %v2756_v9 }
 0x41d   : > { %v1014_v2 = vadd.f32 %v1012_v58, %v1007_v0 }
 0x41e   : > { %v1015_v3 = vadd.f32 %v1012_v58, %v1008_v42  ;;  %1022 = vst.msk [vmem:[#allocation2 + $0x18] sm:$0xff] %vm227_vm0, %v1019_v46 }
 0x41f   : > { %v1017_v4 = vmul.f32 %v1014_v2, %v2752_v7 }
 0x420   : > { %v1018_v5 = vmul.f32 %v1015_v3, %v2754_v8 }
 0x422   : > { %v2432_v10 = vpack.i.bf16 %v1018_v5, %v1017_v4 }
 0x424   : > { %2433 = vrot.lane.b32.xlu0 %v2432_v10, %s2690_s23 }
 0x425   : > { %v1026_v11 = vld [vmem:[#allocation2 + $0x18] sm:$0xff] }
 0x426   : > { %v2412_v13 = vpack.i.bf16 %v3035_v36, %v1026_v11 }
 0x428   : > { %2413 = vrot.lane.b32.xlu1 %v2412_v13, %s2691_s24  ;;  %2438 = vrot.lane.b32.xlu0 %v2432_v10, %s2692_s25 }
 0x42c   : > { %2418 = vrot.lane.b32.xlu1 %v2412_v13, %s2690_s23  ;;  %2443 = vrot.lane.b32.xlu0 %v2432_v10, %s2693_s26 }
 0x430   : > { %2423 = vrot.lane.b32.xlu1 %v2412_v13, %s2692_s25  ;;  %2448 = vrot.lane.b32.xlu0 %v2432_v10, %s2694_s27 }
 0x434   : > { %1068 = vrot.lane.b32.xlu1 %v1026_v11, %s2693_s26  ;;  %2453 = vrot.lane.b32.xlu0 %v2432_v10, %s2695_s28 }
 0x438   : > { %2428 = vrot.lane.b32.xlu1 %v2432_v10, %s2691_s24  ;;  %2458 = vrot.lane.b32.xlu0 %v2432_v10, %s2696_s29 }
 0x43c   : > { %1076 = vrot.lane.b32.xlu1 %v1026_v11, %s2694_s27  ;;  %1096 = vrot.lane.b32.xlu0 %v1017_v4, %s2697_s30 }
 0x440   : > { %1084 = vrot.lane.b32.xlu1 %v1026_v11, %s2695_s28  ;;  %1100 = vrot.lane.b32.xlu0 %v1026_v11, %s2697_s30 }
 0x444   : > { %1092 = vrot.lane.b32.xlu1 %v1026_v11, %s2696_s29 }
 0x448   : > { %1098 = vrot.lane.b32.xlu1 %v1018_v5, %s2697_s30 }
 0x44c   : > { %2463 = vrot.lane.b32.xlu1 %v2432_v10, %s2698_s5 }
 0x496   : > { %v2434_v14 = vpop.permute.xlu0 %2433 }
 0x497   : > { %v2435_v50 = vunpack.i.l.bf16 %v2434_v14  ;;  %v2436_v52 = vunpack.i.h.bf16 %v2434_v14 }
 0x499   : > { %v1051_v59 = vsel %vm257_vm3, %v2435_v50, %v2436_v52 }
 0x49a   : > { %v2414_v15 = vpop.permute.xlu1 %2413  ;;  %v3073_v16 = vpop.permute.xlu0 %2438 }
 0x49b   : > { %v2415_v12 = vunpack.i.l.bf16 %v2414_v15  ;;  %v2416_v32 = vunpack.i.h.bf16 %v2414_v15  ;;  %v2440_v39 = vunpack.i.l.bf16 %v3073_v16  ;;  %v2441_v0 = vunpack.i.h.bf16 %v3073_v16 }
 0x49d   : > { %v2467_v6 = vpack.i.bf16 %v2415_v12, %v1026_v11  ;;  %v1062_v10 = vsel %vm269_vm2, %v2440_v39, %v2441_v0 }
 0x49e   : > { %v2419_v17 = vpop.permute.xlu1 %2418  ;;  %v2444_v31 = vpop.permute.xlu0 %2443 }
 0x49f   : > { %2468 = vrot.lane.b32.xlu0 %v2467_v6, %s2698_s5  ;;  %v2420_v20 = vunpack.i.l.bf16 %v2419_v17  ;;  %v2445_v22 = vunpack.i.l.bf16 %v2444_v31  ;;  %v2421_v49 = vunpack.i.h.bf16 %v2419_v17  ;;  %v2446_v60 = vunpack.i.h.bf16 %v2444_v31 }
 0x4a1   : > { %v1050_v53 = vsel %vm257_vm3, %v2421_v49, %v2435_v50  ;;  %v1052_v56 = vsel %vm257_vm3, %v2436_v52, %v2420_v20  ;;  %v1070_v3 = vsel %vm279_vm6, %v2445_v22, %v2446_v60 }
 0x4a2   : > { %v2424_v18 = vpop.permute.xlu1 %2423  ;;  %v3076_v19 = vpop.permute.xlu0 %2448  ;;  %v2512_v63 = vpack.i.bf16 %v1052_v56, %v1051_v59 }
 0x4a3   : > { %v2425_v21 = vunpack.i.l.bf16 %v2424_v18  ;;  %v2450_v23 = vunpack.i.l.bf16 %v3076_v19  ;;  %v2426_v44 = vunpack.i.h.bf16 %v2424_v18  ;;  %v2451_v11 = vunpack.i.h.bf16 %v3076_v19 }
 0x4a5   : > { %v2472_v24 = vpack.i.bf16 %v2425_v21, %v2420_v20  ;;  %v2487_v25 = vpack.i.bf16 %v2450_v23, %v2445_v22  ;;  %v1061_v41 = vsel %vm269_vm2, %v2426_v44, %v2440_v39  ;;  %v1063_v2 = vsel %vm269_vm2, %v2441_v0, %v2425_v21 }
 0x4a6   : > { %v1069_v26 = vpop.permute.xlu1 %1068  ;;  %v2454_v27 = vpop.permute.xlu0 %2453  ;;  %v2502_v55 = vpack.i.bf16 %v1061_v41, %v1050_v53  ;;  %v2517_v14 = vpack.i.bf16 %v1063_v2, %v1062_v10  ;;  %v1078_v6 = vsel %vm288_vm4, %v2450_v23, %v2451_v11 }
 0x4a7   : > { %2473 = vrot.lane.b32.xlu0 %v2472_v24, %s2698_s5  ;;  %2488 = vrot.lane.b32.xlu1 %v2487_v25, %s2698_s5  ;;  %v2455_v1 = vunpack.i.l.bf16 %v2454_v27  ;;  %v1071_v42 = vsel %vm279_vm6, %v2446_v60, %v1069_v26  ;;  %v2456_v4 = vunpack.i.h.bf16 %v2454_v27 }
 0x4a8   : > { %v2522_v5 = vpack.i.bf16 %v1071_v42, %v1070_v3 }
 0x4a9   : > { %v1086_v16 = vsel %vm297_vm7, %v2455_v1, %v2456_v4 }
 0x4aa   : > { %v2429_v28 = vpop.permute.xlu1 %2428  ;;  %v2459_v29 = vpop.permute.xlu0 %2458 }
 0x4ab   : > { %v2430_v33 = vunpack.i.l.bf16 %v2429_v28  ;;  %v2460_v37 = vunpack.i.l.bf16 %v2459_v29  ;;  %v2431_v54 = vunpack.i.h.bf16 %v2429_v28  ;;  %v2461_v17 = vunpack.i.h.bf16 %v2459_v29 }
 0x4ad   : > { %v1039_v38 = vsel %vm245_vm1, %v2416_v32, %v2430_v33  ;;  %v2492_v43 = vpack.i.bf16 %v2460_v37, %v2455_v1  ;;  %v1041_v61 = vsel %vm245_vm1, %v2431_v54, %v2415_v12  ;;  %v1040_v62 = vsel %vm245_vm1, %v2430_v33, %v2431_v54 }
 0x4ae   : > { %v1077_v45 = vpop.permute.xlu1 %1076  ;;  %v2497_v47 = vpack.i.bf16 %v1039_v38, %v3035_v36  ;;  %v2507_v46 = vpack.i.bf16 %v1041_v61, %v1040_v62  ;;  %v1097_v20 = vpop.permute.xlu0 %1096  ;;  %v1094_v21 = vsel %vm306_vm5, %v2460_v37, %v2461_v17 }
 0x4af   : > { %v2477_v48 = vpack.i.bf16 %v1077_v45, %v1069_v26  ;;  %2493 = vrot.lane.b32.xlu1 %v2492_v43, %s2698_s5  ;;  %v1079_v15 = vsel %vm288_vm4, %v2451_v11, %v1077_v45  ;;  %v1877_v26 = vld [vmem:[%s3312_s3 + $0x10] sm:$0xff] }
 0x4b0   : > { %v2527_v31 = vpack.i.bf16 %v1079_v15, %v1078_v6 }
 0x4b1   : > { %2478 = vrot.lane.b32.xlu0 %v2477_v48, %s2698_s5 }
 0x4b2   : > { %v1085_v51 = vpop.permute.xlu1 %1084  ;;  %v1101_v23 = vpop.permute.xlu0 %1100 }
 0x4b3   : > { %2498 = vrot.lane.b32.xlu1 %v2497_v47, %s2698_s5  ;;  %v1087_v13 = vsel %vm297_vm7, %v2456_v4, %v1085_v51 }
 0x4b4   : > { %v2532_v12 = vpack.i.bf16 %v1087_v13, %v1086_v16 }
 0x4b6   : > { %v1093_v57 = vpop.permute.xlu1 %1092 }
 0x4b7   : > { %v2482_v58 = vpack.i.bf16 %v1093_v57, %v1085_v51  ;;  %2503 = vrot.lane.b32.xlu1 %v2502_v55, %s2698_s5  ;;  %v1095_v19 = vsel %vm306_vm5, %v2461_v17, %v1093_v57 }
 0x4b8   : > { %v2537_v24 = vpack.i.bf16 %v1095_v19, %v1094_v21 }
 0x4b9   : > { %2483 = vrot.lane.b32.xlu0 %v2482_v58, %s2698_s5 }
 0x4ba   : > { %v1099_v18 = vpop.permute.xlu1 %1098 }
 0x4bb   : > { %2513 = vrot.lane.b32.xlu1 %v2512_v63, %s2698_s5  ;;  %v1102_v22 = vsel %vm315_vm8, %v1097_v20, %v1099_v18  ;;  %v1103_v25 = vsel %vm315_vm8, %v1099_v18, %v1101_v23 }
 0x4bd   : > { %2508 = vrot.lane.b32.xlu0 %v2507_v46, %s2698_s5 }
 0x4be   : > { %v2464_v27 = vpop.permute.xlu1 %2463 }
 0x4bf   : > { %2523 = vrot.lane.b32.xlu1 %v2522_v5, %s2698_s5  ;;  %v2466_v43 = vunpack.i.h.bf16 %v2464_v27  ;;  %v2465_v44 = vunpack.i.l.bf16 %v2464_v27 }
 0x4c1   : > { %2518 = vrot.lane.b32.xlu0 %v2517_v14, %s2698_s5  ;;  %v1179_v41 = vsel %vm391_vm10, %v2465_v44, %v2466_v43 }
 0x4c3   : > { %2533 = vrot.lane.b32.xlu1 %v2532_v12, %s2698_s5 }
 0x4c5   : > { %2528 = vrot.lane.b32.xlu0 %v2527_v31, %s2698_s5 }
 0x4c7   : > { %1172 = vrot.lane.b32.xlu1 %v1102_v22, %s2698_s5 }
 0x4c9   : > { %2538 = vrot.lane.b32.xlu0 %v2537_v24, %s2698_s5 }
 0x4cb   : > { %1170 = vrot.lane.b32.xlu1 %v1097_v20, %s2698_s5 }
 0x4cd   : > { %1174 = vrot.lane.b32.xlu0 %v1103_v25, %s2698_s5 }
 0x4cf   : > { %1380 = vperm.xlu1 %2542, %v1877_v26  }
 0x4d1   : > { %1176 = vrot.lane.b32.xlu0 %v1101_v23, %s2698_s5 }
 0x4d3   : > { %2544 = vset.pattern.permute.xlu1 %v2703_v34 }
 0x4d4   : > { %1397 = vperm.xlu1 %2544, %v1877_v26  }
 0x4d5   : > { %1387 = vperm.xlu0 %2543, %v1877_v26  }
 0x4d8   : > { %2545 = vset.pattern.permute.xlu1 %v2704_v35 }
 0x4d9   : > { %1404 = vperm.xlu1 %2545, %v1877_v26  }
 0x4dd   : > { %2676 = vset.pattern.permute.xlu1 %v2701_v30 }
 0x511   : > { %v2469_v29 = vpop.permute.xlu0 %2468 }
 0x512   : > { %v2470_v45 = vunpack.i.l.bf16 %v2469_v29  ;;  %v2471_v39 = vunpack.i.h.bf16 %v2469_v29 }
 0x514   : > { %v1180_v30 = vsel %vm391_vm10, %v2466_v43, %v2470_v45 }
 0x519   : > { %v3126_v28 = vpop.permute.xlu1 %2488  ;;  %v2474_v33 = vpop.permute.xlu0 %2473 }
 0x51a   : > { %v2476_v51 = vunpack.i.h.bf16 %v2474_v33  ;;  %v2475_v55 = vunpack.i.l.bf16 %v2474_v33  ;;  %v2491_v56 = vunpack.i.h.bf16 %v3126_v28  ;;  %v2490_v19 = vunpack.i.l.bf16 %v3126_v28 }
 0x521   : > { %v3128_v32 = vpop.permute.xlu1 %2493 }
 0x522   : > { %v2495_v28 = vunpack.i.l.bf16 %v3128_v32 }
 0x523   : > { %v3130_v37 = vpop.permute.xlu0 %2478 }
 0x524   : > { %v2480_v12 = vunpack.i.l.bf16 %v3130_v37  ;;  %v2481_v23 = vunpack.i.h.bf16 %v3130_v37 }
 0x525   : > { %v2499_v1 = vpop.permute.xlu1 %2498 }
 0x526   : > { %v2500_v49 = vunpack.i.l.bf16 %v2499_v1  ;;  %v2501_v52 = vunpack.i.h.bf16 %v2499_v1 }
 0x528   : > { %v1178_v60 = vsel %vm391_vm10, %v2500_v49, %v2465_v44 }
 0x529   : > { %v2504_v38 = vpop.permute.xlu1 %2503 }
 0x52a   : > { %v2505_v46 = vunpack.i.l.bf16 %v2504_v38  ;;  %v2506_v4 = vunpack.i.h.bf16 %v2504_v38 }
 0x52b   : > { %v3132_v47 = vpop.permute.xlu0 %2483 }
 0x52c   : > { %v2485_v45 = vunpack.i.l.bf16 %v3132_v47 }
 0x52d   : > { %v2514_v48 = vpop.permute.xlu1 %2513 }
 0x52e   : > { %v2516_v57 = vunpack.i.h.bf16 %v2514_v48  ;;  %v2515_v58 = vunpack.i.l.bf16 %v2514_v48 }
 0x52f   : > { %v2509_v50 = vpop.permute.xlu0 %2508 }
 0x530   : > { %v2511_v53 = vunpack.i.h.bf16 %v2509_v50  ;;  %v2510_v54 = vunpack.i.l.bf16 %v2509_v50  ;;  %v1186_v13 = vsel %vm391_vm10, %v2516_v57, %v2475_v55  ;;  %v1184_v14 = vsel %vm391_vm10, %v2505_v46, %v2515_v58 }
 0x531   : > { %v2524_v59 = vpop.permute.xlu1 %2523  ;;  %v1185_v16 = vsel %vm391_vm10, %v2515_v58, %v2516_v57  ;;  %v2496_v50 = vunpack.i.h.bf16 %v3128_v32 }
 0x532   : > { %v1183_v61 = vsel %vm391_vm10, %v2511_v53, %v2471_v39  ;;  %v1181_v62 = vsel %vm391_vm10, %v2501_v52, %v2510_v54  ;;  %v1182_v63 = vsel %vm391_vm10, %v2510_v54, %v2511_v53  ;;  %v2526_v11 = vunpack.i.h.bf16 %v2524_v59 }
 0x533   : > { %v2081_v0 = vpack.c.bf16 %v1183_v61, %v1180_v30  ;;  %v2066_v42 = vpack.c.bf16 %v1181_v62, %v1178_v60  ;;  %v2519_v2 = vpop.permute.xlu0 %2518  ;;  %v2064_v3 = vpack.c.bf16 %v1182_v63, %v1179_v41  ;;  %v2525_v15 = vunpack.i.l.bf16 %v2524_v59 }
 0x534   : > { %v2521_v5 = vunpack.i.h.bf16 %v2519_v2  ;;  %v2520_v10 = vunpack.i.l.bf16 %v2519_v2  ;;  %v1192_v27 = vsel %vm391_vm10, %v2526_v11, %v2480_v12  ;;  %v2486_v41 = vunpack.i.h.bf16 %v3132_v47 }
 0x535   : > { %2065 = vmatprep.subr.bf16.mxu0 %v2064_v3  ;;  %2082 = vmatpush3.bf16.msra.mxu1 %v2081_v0  ;;  %v2534_v18 = vpop.permute.xlu1 %2533  ;;  %v1190_v29 = vsel %vm391_vm10, %v2490_v19, %v2525_v15  ;;  %v1191_v38 = vsel %vm391_vm10, %v2525_v15, %v2526_v11 }
 0x536   : > { %v1189_v6 = vsel %vm391_vm10, %v2521_v5, %v2476_v51  ;;  %v1187_v17 = vsel %vm391_vm10, %v2506_v4, %v2520_v10  ;;  %2067 = vmatpush1.bf16.msra.mxu0 %v2066_v42  ;;  %2083 = vmatprep.subr.bf16.mxu1 %v2699_v40  ;;  %v1188_v31 = vsel %vm391_vm10, %v2520_v10, %v2521_v5  ;;  %v2536_v33 = vunpack.i.h.bf16 %v2534_v18  ;;  %v1874_v42 = vld [vmem:[%s3311_s2 + $0x10] sm:$0xff] }
 0x537   : > { %v2084_v20 = vpack.c.bf16 %v1189_v6, %v1186_v13  ;;  %v2070_v21 = vpack.c.bf16 %v1187_v17, %v1184_v14  ;;  %v2529_v22 = vpop.permute.xlu0 %2528  ;;  %v2068_v24 = vpack.c.bf16 %v1188_v31, %v1185_v16  ;;  %v2535_v1 = vunpack.i.l.bf16 %v2534_v18 }
 0x538   : > { %v2531_v25 = vunpack.i.h.bf16 %v2529_v22  ;;  %v2530_v26 = vunpack.i.l.bf16 %v2529_v22  ;;  %v1198_v54 = vsel %vm391_vm10, %v2536_v33, %v2485_v45 }
 0x539   : > { %2069 = vmatprep.subr.bf16.mxu0 %v2068_v24  ;;  %2085 = vmatpush3.bf16.msra.mxu1 %v2084_v20  ;;  %v1173_v53 = vpop.permute.xlu1 %1172  ;;  %v1196_v55 = vsel %vm391_vm10, %v2495_v28, %v2535_v1 }
 0x53a   : > { %v1195_v43 = vsel %vm391_vm10, %v2531_v25, %v2481_v23  ;;  %v1193_v44 = vsel %vm391_vm10, %v2491_v56, %v2530_v26  ;;  %2071 = vmatpush1.bf16.msra.mxu0 %v2070_v21  ;;  %2086 = vmatprep.subr.bf16.mxu1 %v2699_v40  ;;  %v1194_v37 = vsel %vm391_vm10, %v2530_v26, %v2531_v25 }
 0x53b   : > { %v2087_v48 = vpack.c.bf16 %v1195_v43, %v1192_v27  ;;  %v2074_v49 = vpack.c.bf16 %v1193_v44, %v1190_v29  ;;  %v2539_v39 = vpop.permute.xlu0 %2538  ;;  %v2072_v30 = vpack.c.bf16 %v1194_v37, %v1191_v38  ;;  %v1197_v56 = vsel %vm391_vm10, %v2535_v1, %v2536_v33 }
 0x53c   : > { %v2541_v51 = vunpack.i.h.bf16 %v2539_v39  ;;  %v2540_v52 = vunpack.i.l.bf16 %v2539_v39 }
 0x53d   : > { %2073 = vmatprep.subr.bf16.mxu0 %v2072_v30  ;;  %2088 = vmatpush3.bf16.msra.mxu1 %v2087_v48  ;;  %v1171_v62 = vpop.permute.xlu1 %1170 }
 0x53e   : > { %v1201_v57 = vsel %vm391_vm10, %v2541_v51, %v2486_v41  ;;  %v1199_v58 = vsel %vm391_vm10, %v2496_v50, %v2540_v52  ;;  %2075 = vmatpush1.bf16.msra.mxu0 %v2074_v49  ;;  %2089 = vmatprep.subr.bf16.mxu1 %v2699_v40  ;;  %v1200_v32 = vsel %vm391_vm10, %v2540_v52, %v2541_v51 }
 0x53f   : > { %v2090_v47 = vpack.c.bf16 %v1201_v57, %v1198_v54  ;;  %v2078_v59 = vpack.c.bf16 %v1199_v58, %v1196_v55  ;;  %v1175_v60 = vpop.permute.xlu0 %1174  ;;  %v2076_v61 = vpack.c.bf16 %v1200_v32, %v1197_v56  ;;  %v1202_v2 = vsel %vm391_vm10, %v1171_v62, %v1173_v53 }
 0x540   : > { %v1203_v63 = vsel %vm391_vm10, %v1173_v53, %v1175_v60 }
 0x541   : > { %2077 = vmatprep.subr.bf16.mxu0 %v2076_v61  ;;  %2091 = vmatpush3.bf16.msra.mxu1 %v2090_v47 }
 0x542   : > { %2079 = vmatpush1.bf16.msra.mxu0 %v2078_v59  ;;  %1982 = vmatprep.subr.mxu1 %v3035_v36 }
 0x543   : > { %v1177_v0 = vpop.permute.xlu0 %1176  ;;  %1251 = vmatprep.subr.mxu0 %v1203_v63 }
 0x544   : > { %v1204_v46 = vsel %vm391_vm10, %v1175_v60, %v1177_v0 }
 0x545   : > { %1983 = vmatpush3.msra.mxu1 %v1204_v46 }
 0x546   : > { %1252 = vmatpush1.msra.mxu0 %v1202_v2  ;;  %1985 = vmatmul.mubr.msk.f32.vlgmr.msra.gmra.mrb[4].mxu1 %vm446_vm11, %v1874_v42 }
 0x547   : > { %1875 = vmatmul.mubr.msk.f32.vlgmr.msra.gmra.mrb[4].mxu0 %vm446_vm11, %v1874_v42  ;;  %2108 = vmatprep.subr.bf16.mxu1 %v2699_v40 }
 0x548   : > { %2005 = vmatprep.mubr.msk.f32.mxu1 %vm2700_vm9, %v3035_v36  ;;  %1692 = vmatprep.mubr.f32.mxu0 %v3035_v36 }
 0x54e   : > { %v1381_v3 = vpop.permute.xlu1 %1380 }
 0x553   : > { %v1398_v10 = vpop.permute.xlu1 %1397 }
 0x554   : > { %v1388_v4 = vpop.permute.xlu0 %1387 }
 0x558   : > { %v1405_v20 = vpop.permute.xlu1 %1404 }
 0x619   : > { %v1372_v5 = vpop.f32.mrb[4].mxu1 }
 0x61a   : > { %v1385_v11 = vmul.f32 %v1381_v3, %v1372_v5  ;;  %v1301_v13 = vpop.f32.mrb[4].mxu0  ;;  %v1986_v14 = vpop.f32.mrb[5].mxu1 }
 0x61b   : > { %v1383_v15 = vmul.f32 %v1381_v3, %v1301_v13  ;;  %v1303_v16 = vpop.f32.mrb[5].mxu0 }
 0x61c   : > { %v1392_v12 = vadd.f32 %v1388_v4, %v1385_v11  ;;  %v1384_v6 = vmul.f32 %v1381_v3, %v1303_v16 }
 0x61d   : > { %v1390_v17 = vadd.f32 %v1388_v4, %v1383_v15 }
 0x61e   : > { %v1395_v31 = vmax.f32 %v1392_v12, 0.0  ;;  %v1391_v18 = vadd.f32 %v1388_v4, %v1384_v6 }
 0x61f   : > { %v1393_v19 = vmax.f32 %v1390_v17, 0.0 }
 0x620   : > { %v1394_v21 = vmax.f32 %v1391_v18, 0.0  ;;  %v1402_v22 = vmul.f32 %v1398_v10, %v1395_v31 }
 0x621   : > { %v1400_v24 = vmul.f32 %v1398_v10, %v1393_v19 }
 0x622   : > { %v1401_v23 = vmul.f32 %v1398_v10, %v1394_v21  ;;  %v1409_v25 = vadd.f32 %v1405_v20, %v1402_v22 }
 0x623   : > { %v1407_v26 = vadd.f32 %v1405_v20, %v1400_v24 }
 0x624   : > { %v1408_v27 = vadd.f32 %v1405_v20, %v1401_v23  ;;  %v1412_v29 = vmul.f32 %v1409_v25, %v2756_v9 }
 0x625   : > { %v1410_v33 = vmul.f32 %v1407_v26, %v2752_v7 }
 0x626   : > { %v1411_v1 = vmul.f32 %v1408_v27, %v2754_v8  ;;  %1415 = vst.msk [vmem:[#allocation2 + $0x18] sm:$0xff] %vm227_vm0, %v1412_v29 }
 0x628   : > { %v2561_v38 = vpack.i.bf16 %v1411_v1, %v1410_v33 }
 0x62a   : > { %2562 = vrot.lane.b32.xlu0 %v2561_v38, %s2691_s24 }
 0x62d   : > { %v1419_v28 = vld [vmem:[#allocation2 + $0x18] sm:$0xff] }
 0x62e   : > { %v2546_v43 = vpack.i.bf16 %v3035_v36, %v1419_v28  ;;  %2567 = vrot.lane.b32.xlu0 %v2561_v38, %s2690_s23 }
 0x630   : > { %2547 = vrot.lane.b32.xlu1 %v2546_v43, %s2691_s24 }
 0x632   : > { %2572 = vrot.lane.b32.xlu0 %v2561_v38, %s2692_s25 }
 0x634   : > { %2552 = vrot.lane.b32.xlu1 %v2546_v43, %s2690_s23 }
 0x636   : > { %2577 = vrot.lane.b32.xlu0 %v2561_v38, %s2693_s26 }
 0x638   : > { %2557 = vrot.lane.b32.xlu1 %v2546_v43, %s2692_s25 }
 0x63a   : > { %2582 = vrot.lane.b32.xlu0 %v2561_v38, %s2694_s27 }
 0x63c   : > { %1461 = vrot.lane.b32.xlu1 %v1419_v28, %s2693_s26 }
 0x63e   : > { %2587 = vrot.lane.b32.xlu0 %v2561_v38, %s2695_s28 }
 0x640   : > { %1469 = vrot.lane.b32.xlu1 %v1419_v28, %s2694_s27  ;;  %s197_s27 = scalar_lea.vmem %s3313_s4, %s2120_s19 }
 0x642   : > { %2592 = vrot.lane.b32.xlu0 %v2561_v38, %s2696_s29 }
 0x644   : > { %1477 = vrot.lane.b32.xlu1 %v1419_v28, %s2695_s28 }
 0x646   : > { %1489 = vrot.lane.b32.xlu0 %v1410_v33, %s2697_s30 }
 0x648   : > { %1485 = vrot.lane.b32.xlu1 %v1419_v28, %s2696_s29 }
 0x64a   : > { %1493 = vrot.lane.b32.xlu0 %v1419_v28, %s2697_s30 }
 0x64c   : > { %1491 = vrot.lane.b32.xlu1 %v1411_v1, %s2697_s30 }
 0x650   : > { %2597 = vrot.lane.b32.xlu1 %v2561_v38, %s2698_s5 }
 0x69c   : > { %v2563_v7 = vpop.permute.xlu0 %2562 }
 0x69d   : > { %v2564_v61 = vunpack.i.l.bf16 %v2563_v7  ;;  %v2565_v46 = vunpack.i.h.bf16 %v2563_v7 }
 0x69f   : > { %v1433_v15 = vsel %vm245_vm1, %v2564_v61, %v2565_v46 }
 0x6a0   : > { %v2568_v8 = vpop.permute.xlu0 %2567 }
 0x6a1   : > { %v2569_v13 = vunpack.i.l.bf16 %v2568_v8  ;;  %v2570_v16 = vunpack.i.h.bf16 %v2568_v8 }
 0x6a2   : > { %v2548_v9 = vpop.permute.xlu1 %2547 }
 0x6a3   : > { %v2549_v44 = vunpack.i.l.bf16 %v2548_v9  ;;  %v2550_v32 = vunpack.i.h.bf16 %v2548_v9  ;;  %v1444_v19 = vsel %vm257_vm3, %v2569_v13, %v2570_v16 }
 0x6a4   : > { %v2573_v37 = vpop.permute.xlu0 %2572 }
 0x6a5   : > { %v2601_v45 = vpack.i.bf16 %v2549_v44, %v1419_v28  ;;  %v1432_v0 = vsel %vm245_vm1, %v2550_v32, %v2564_v61  ;;  %v2574_v3 = vunpack.i.l.bf16 %v2573_v37  ;;  %v1434_v11 = vsel %vm245_vm1, %v2565_v46, %v2549_v44 }
 0x6a6   : > { %v2553_v48 = vpop.permute.xlu1 %2552  ;;  %v2631_v5 = vpack.i.bf16 %v1432_v0, %v3035_v36  ;;  %v2575_v6 = vunpack.i.h.bf16 %v2573_v37  ;;  %v2641_v17 = vpack.i.bf16 %v1434_v11, %v1433_v15 }
 0x6a7   : > { %2602 = vrot.lane.b32.xlu0 %v2601_v45, %s2698_s5  ;;  %v2554_v30 = vunpack.i.l.bf16 %v2553_v48  ;;  %v2555_v2 = vunpack.i.h.bf16 %v2553_v48 }
 0x6a8   : > { %v2578_v49 = vpop.permute.xlu0 %2577  ;;  %v1455_v20 = vsel %vm269_vm2, %v2574_v3, %v2575_v6 }
 0x6a9   : > { %v2579_v53 = vunpack.i.l.bf16 %v2578_v49  ;;  %v1443_v12 = vsel %vm257_vm3, %v2555_v2, %v2569_v13  ;;  %v1445_v36 = vsel %vm257_vm3, %v2570_v16, %v2554_v30  ;;  %v2580_v21 = vunpack.i.h.bf16 %v2578_v49 }
 0x6aa   : > { %v2558_v39 = vpop.permute.xlu1 %2557  ;;  %v2646_v24 = vpack.i.bf16 %v1445_v36, %v1444_v19 }
 0x6ab   : > { %v2559_v50 = vunpack.i.l.bf16 %v2558_v39  ;;  %v2560_v42 = vunpack.i.h.bf16 %v2558_v39  ;;  %v1463_v27 = vsel %vm279_vm6, %v2579_v53, %v2580_v21 }
 0x6ac   : > { %v2583_v41 = vpop.permute.xlu0 %2582 }
 0x6ad   : > { %v2606_v51 = vpack.i.bf16 %v2559_v50, %v2554_v30  ;;  %v2584_v54 = vunpack.i.l.bf16 %v2583_v41  ;;  %v1454_v14 = vsel %vm269_vm2, %v2560_v42, %v2574_v3  ;;  %v1456_v18 = vsel %vm269_vm2, %v2575_v6, %v2559_v50  ;;  %v1881_v50 = vld [vmem:[%s3312_s3 + $0x18] sm:$0xff] }
 0x6ae   : > { %v1462_v52 = vpop.permute.xlu1 %1461  ;;  %v2636_v31 = vpack.i.bf16 %v1454_v14, %v1443_v12  ;;  %v2585_v22 = vunpack.i.h.bf16 %v2583_v41  ;;  %v2651_v23 = vpack.i.bf16 %v1456_v18, %v1455_v20 }
 0x6af   : > { %2607 = vrot.lane.b32.xlu0 %v2606_v51, %s2698_s5  ;;  %v2621_v55 = vpack.i.bf16 %v2584_v54, %v2579_v53  ;;  %v1464_v25 = vsel %vm279_vm6, %v2580_v21, %v1462_v52 }
 0x6b0   : > { %v2588_v56 = vpop.permute.xlu0 %2587  ;;  %v1471_v29 = vsel %vm288_vm4, %v2584_v54, %v2585_v22  ;;  %v2656_v38 = vpack.i.bf16 %v1464_v25, %v1463_v27 }
 0x6b1   : > { %2622 = vrot.lane.b32.xlu1 %v2621_v55, %s2698_s5  ;;  %v2589_v59 = vunpack.i.l.bf16 %v2588_v56  ;;  %v2590_v33 = vunpack.i.h.bf16 %v2588_v56 }
 0x6b2   : > { %v1470_v57 = vpop.permute.xlu1 %1469 }
 0x6b3   : > { %v2611_v58 = vpack.i.bf16 %v1470_v57, %v1462_v52  ;;  %v1472_v26 = vsel %vm288_vm4, %v2585_v22, %v1470_v57  ;;  %v1479_v9 = vsel %vm297_vm7, %v2589_v59, %v2590_v33 }
 0x6b4   : > { %v2593_v47 = vpop.permute.xlu0 %2592  ;;  %v2661_v28 = vpack.i.bf16 %v1472_v26, %v1471_v29 }
 0x6b5   : > { %2612 = vrot.lane.b32.xlu0 %v2611_v58, %s2698_s5  ;;  %v2594_v60 = vunpack.i.l.bf16 %v2593_v47  ;;  %v2595_v1 = vunpack.i.h.bf16 %v2593_v47 }
 0x6b6   : > { %v1478_v62 = vpop.permute.xlu1 %1477 }
 0x6b7   : > { %v2626_v63 = vpack.i.bf16 %v2594_v60, %v2589_v59  ;;  %v1480_v43 = vsel %vm297_vm7, %v2590_v33, %v1478_v62  ;;  %v1487_v44 = vsel %vm306_vm5, %v2594_v60, %v2595_v1 }
 0x6b8   : > { %v1490_v8 = vpop.permute.xlu0 %1489  ;;  %v2666_v37 = vpack.i.bf16 %v1480_v43, %v1479_v9 }
 0x6b9   : > { %2627 = vrot.lane.b32.xlu1 %v2626_v63, %s2698_s5 }
 0x6ba   : > { %v1486_v4 = vpop.permute.xlu1 %1485 }
 0x6bb   : > { %v2616_v10 = vpack.i.bf16 %v1486_v4, %v1478_v62  ;;  %v1488_v7 = vsel %vm306_vm5, %v2595_v1, %v1486_v4 }
 0x6bc   : > { %v2671_v45 = vpack.i.bf16 %v1488_v7, %v1487_v44  ;;  %v1494_v49 = vpop.permute.xlu0 %1493 }
 0x6bd   : > { %2617 = vrot.lane.b32.xlu0 %v2616_v10, %s2698_s5  ;;  %2632 = vrot.lane.b32.xlu1 %v2631_v5, %s2698_s5 }
 0x6be   : > { %v1492_v48 = vpop.permute.xlu1 %1491 }
 0x6bf   : > { %v1495_v39 = vsel %vm315_vm8, %v1490_v8, %v1492_v48  ;;  %v1496_v30 = vsel %vm315_vm8, %v1492_v48, %v1494_v49 }
 0x6c1   : > { %2642 = vrot.lane.b32.xlu0 %v2641_v17, %s2698_s5  ;;  %2637 = vrot.lane.b32.xlu1 %v2636_v31, %s2698_s5 }
 0x6c2   : > { %v2598_v41 = vpop.permute.xlu1 %2597 }
 0x6c3   : > { %v2600_v56 = vunpack.i.h.bf16 %v2598_v41  ;;  %v2599_v57 = vunpack.i.l.bf16 %v2598_v41 }
 0x6c5   : > { %2652 = vrot.lane.b32.xlu0 %v2651_v23, %s2698_s5  ;;  %2647 = vrot.lane.b32.xlu1 %v2646_v24, %s2698_s5  ;;  %v1572_v60 = vsel %vm391_vm10, %v2599_v57, %v2600_v56 }
 0x6c9   : > { %2662 = vrot.lane.b32.xlu0 %v2661_v28, %s2698_s5  ;;  %2657 = vrot.lane.b32.xlu1 %v2656_v38, %s2698_s5 }
 0x6cd   : > { %2672 = vrot.lane.b32.xlu0 %v2671_v45, %s2698_s5  ;;  %2667 = vrot.lane.b32.xlu1 %v2666_v37, %s2698_s5 }
 0x6d1   : > { %1567 = vrot.lane.b32.xlu0 %v1496_v30, %s2698_s5  ;;  %1565 = vrot.lane.b32.xlu1 %v1495_v39, %s2698_s5 }
 0x6d5   : > { %1569 = vrot.lane.b32.xlu0 %v1494_v49, %s2698_s5  ;;  %1563 = vrot.lane.b32.xlu1 %v1490_v8, %s2698_s5 }
 0x6d9   : > { %1780 = vperm.xlu0 %2543, %v1881_v50   ;;  %1773 = vperm.xlu1 %2676, %v1881_v50  }
 0x6dd   : > { %2677 = vset.pattern.permute.xlu1 %v2703_v34  ;;  %2678 = vset.pattern.permute.xlu0 %v2704_v35 }
 0x6de   : > { %1790 = vperm.xlu1 %2677, %v1881_v50   ;;  %1797 = vperm.xlu0 %2678, %v1881_v50  }
 0x719   : > { %v2603_v51 = vpop.permute.xlu0 %2602 }
 0x71a   : > { %v2604_v47 = vunpack.i.l.bf16 %v2603_v51  ;;  %v2605_v59 = vunpack.i.h.bf16 %v2603_v51 }
 0x71c   : > { %v1573_v62 = vsel %vm391_vm10, %v2600_v56, %v2604_v47 }
 0x721   : > { %v2608_v52 = vpop.permute.xlu0 %2607 }
 0x722   : > { %v2610_v46 = vunpack.i.h.bf16 %v2608_v52  ;;  %v2609_v2 = vunpack.i.l.bf16 %v2608_v52 }
 0x723   : > { %v3249_v53 = vpop.permute.xlu1 %2622 }
 0x724   : > { %v2625_v3 = vunpack.i.h.bf16 %v3249_v53  ;;  %v2624_v22 = vunpack.i.l.bf16 %v3249_v53 }
 0x727   : > { %v3251_v54 = vpop.permute.xlu0 %2612 }
 0x728   : > { %v2615_v20 = vunpack.i.h.bf16 %v3251_v54  ;;  %v2614_v21 = vunpack.i.l.bf16 %v3251_v54 }
 0x72b   : > { %v3253_v55 = vpop.permute.xlu1 %2627 }
 0x72c   : > { %v2630_v24 = vunpack.i.h.bf16 %v3253_v55  ;;  %v2629_v48 = vunpack.i.l.bf16 %v3253_v55 }
 0x72f   : > { %v3255_v58 = vpop.permute.xlu0 %2617  ;;  %v2633_v32 = vpop.permute.xlu1 %2632 }
 0x730   : > { %v2634_v34 = vunpack.i.l.bf16 %v2633_v32  ;;  %v2635_v42 = vunpack.i.h.bf16 %v2633_v32  ;;  %v2620_v37 = vunpack.i.h.bf16 %v3255_v58  ;;  %v2619_v45 = vunpack.i.l.bf16 %v3255_v58 }
 0x732   : > { %v1571_v4 = vsel %vm391_vm10, %v2634_v34, %v2599_v57 }
 0x733   : > { %v2643_v35 = vpop.permute.xlu0 %2642  ;;  %v2638_v61 = vpop.permute.xlu1 %2637 }
 0x734   : > { %v2645_v63 = vunpack.i.h.bf16 %v2643_v35  ;;  %v2644_v0 = vunpack.i.l.bf16 %v2643_v35  ;;  %v2640_v13 = vunpack.i.h.bf16 %v2638_v61  ;;  %v2639_v6 = vunpack.i.l.bf16 %v2638_v61 }
 0x736   : > { %v1576_v5 = vsel %vm391_vm10, %v2645_v63, %v2605_v59  ;;  %v1574_v10 = vsel %vm391_vm10, %v2635_v42, %v2644_v0  ;;  %v1575_v11 = vsel %vm391_vm10, %v2644_v0, %v2645_v63 }
 0x737   : > { %v2109_v14 = vpack.c.bf16 %v1576_v5, %v1573_v62  ;;  %v2653_v15 = vpop.permute.xlu0 %2652  ;;  %v2094_v16 = vpack.c.bf16 %v1574_v10, %v1571_v4  ;;  %v2092_v12 = vpack.c.bf16 %v1575_v11, %v1572_v60  ;;  %v2648_v17 = vpop.permute.xlu1 %2647  ;;  %v2680_v4 = vld [vmem:[#allocation2] sm:$0xff] }
 0x738   : > { %v2655_v31 = vunpack.i.h.bf16 %v2653_v15  ;;  %v2654_v36 = vunpack.i.l.bf16 %v2653_v15  ;;  %v2650_v18 = vunpack.i.h.bf16 %v2648_v17  ;;  %v2649_v19 = vunpack.i.l.bf16 %v2648_v17 }
 0x739   : > { %2093 = vmatprep.subr.bf16.mxu0 %v2092_v12  ;;  %2110 = vmatpush3.bf16.msra.mxu1 %v2109_v14 }
 0x73a   : > { %v1582_v23 = vsel %vm391_vm10, %v2655_v31, %v2610_v46  ;;  %v1580_v25 = vsel %vm391_vm10, %v2640_v13, %v2654_v36  ;;  %2095 = vmatpush1.bf16.msra.mxu0 %v2094_v16  ;;  %v1579_v26 = vsel %vm391_vm10, %v2650_v18, %v2609_v2  ;;  %v1577_v27 = vsel %vm391_vm10, %v2639_v6, %v2649_v19 }
 0x73b   : > { %v2663_v29 = vpop.permute.xlu0 %2662  ;;  %v2112_v33 = vpack.c.bf16 %v1582_v23, %v1579_v26  ;;  %v2098_v1 = vpack.c.bf16 %v1580_v25, %v1577_v27  ;;  %v2658_v38 = vpop.permute.xlu1 %2657  ;;  %2111 = vmatprep.subr.bf16.mxu1 %v2699_v40  ;;  %v1578_v28 = vsel %vm391_vm10, %v2649_v19, %v2650_v18  ;;  %v1581_v43 = vsel %vm391_vm10, %v2654_v36, %v2655_v31 }
 0x73c   : > { %v2665_v7 = vunpack.i.h.bf16 %v2663_v29  ;;  %v2664_v8 = vunpack.i.l.bf16 %v2663_v29  ;;  %v2660_v9 = vunpack.i.h.bf16 %v2658_v38  ;;  %v2659_v44 = vunpack.i.l.bf16 %v2658_v38 }
 0x73d   : > { %v2096_v49 = vpack.c.bf16 %v1581_v43, %v1578_v28  ;;  %2113 = vmatpush3.bf16.msra.mxu1 %v2112_v33 }
 0x73e   : > { %v1588_v39 = vsel %vm391_vm10, %v2665_v7, %v2615_v20  ;;  %v1586_v30 = vsel %vm391_vm10, %v2625_v3, %v2664_v8  ;;  %v1585_v50 = vsel %vm391_vm10, %v2660_v9, %v2614_v21  ;;  %v1583_v41 = vsel %vm391_vm10, %v2624_v22, %v2659_v44  ;;  %2114 = vmatprep.subr.bf16.mxu1 %v2699_v40 }
 0x73f   : > { %v2673_v51 = vpop.permute.xlu0 %2672  ;;  %v2115_v52 = vpack.c.bf16 %v1588_v39, %v1585_v50  ;;  %v2102_v53 = vpack.c.bf16 %v1586_v30, %v1583_v41  ;;  %2097 = vmatprep.subr.bf16.mxu0 %v2096_v49  ;;  %v2668_v54 = vpop.permute.xlu1 %2667  ;;  %v1584_v56 = vsel %vm391_vm10, %v2659_v44, %v2660_v9  ;;  %v1587_v55 = vsel %vm391_vm10, %v2664_v8, %v2665_v7 }
 0x740   : > { %v2675_v57 = vunpack.i.h.bf16 %v2673_v51  ;;  %v2674_v58 = vunpack.i.l.bf16 %v2673_v51  ;;  %2099 = vmatpush1.bf16.msra.mxu0 %v2098_v1  ;;  %v2670_v32 = vunpack.i.h.bf16 %v2668_v54  ;;  %v2669_v47 = vunpack.i.l.bf16 %v2668_v54 }
 0x741   : > { %v2100_v34 = vpack.c.bf16 %v1587_v55, %v1584_v56  ;;  %2116 = vmatpush3.bf16.msra.mxu1 %v2115_v52 }
 0x742   : > { %v1594_v59 = vsel %vm391_vm10, %v2675_v57, %v2620_v37  ;;  %v1592_v35 = vsel %vm391_vm10, %v2630_v24, %v2674_v58  ;;  %v1591_v60 = vsel %vm391_vm10, %v2670_v32, %v2619_v45  ;;  %v1589_v61 = vsel %vm391_vm10, %v2629_v48, %v2669_v47  ;;  %2117 = vmatprep.subr.bf16.mxu1 %v2699_v40  ;;  %v1878_v40 = vld [vmem:[%s3311_s2 + $0x18] sm:$0xff] }
 0x743   : > { %v1568_v62 = vpop.permute.xlu0 %1567  ;;  %v2118_v63 = vpack.c.bf16 %v1594_v59, %v1591_v60  ;;  %2101 = vmatprep.subr.bf16.mxu0 %v2100_v34  ;;  %v1566_v0 = vpop.permute.xlu1 %1565  ;;  %v1590_v42 = vsel %vm391_vm10, %v2669_v47, %v2670_v32  ;;  %v1593_v46 = vsel %vm391_vm10, %v2674_v58, %v2675_v57  ;;  %v2106_v2 = vpack.c.bf16 %v1592_v35, %v1589_v61 }
 0x744   : > { %2103 = vmatpush1.bf16.msra.mxu0 %v2102_v53  ;;  %v2104_v3 = vpack.c.bf16 %v1593_v46, %v1590_v42  ;;  %v1596_v13 = vsel %vm391_vm10, %v1566_v0, %v1568_v62 }
 0x745   : > { %2119 = vmatpush3.bf16.msra.mxu1 %v2118_v63 }
 0x746   : > { %2105 = vmatprep.subr.bf16.mxu0 %v2104_v3  ;;  %2003 = vmatprep.subr.mxu1 %v2680_v4 }
 0x747   : > { %v1570_v5 = vpop.permute.xlu0 %1569  ;;  %v1564_v10 = vpop.permute.xlu1 %1563 }
 0x748   : > { %v1597_v11 = vsel %vm391_vm10, %v1568_v62, %v1570_v5  ;;  %2107 = vmatpush1.bf16.msra.mxu0 %v2106_v2  ;;  %v1595_v14 = vsel %vm391_vm10, %v1564_v10, %v1566_v0 }
 0x749   : > { %1644 = vmatprep.subr.mxu0 %v1596_v13  ;;  %2004 = vmatpush3.msra.mxu1 %v1597_v11 }
 0x74a   : > { %2006 = vmatmul.mubr.msk.f32.vlgmr.msra.gmra.mrb[6].mxu1 %vm446_vm11, %v1878_v40 }
 0x74c   : > { %1645 = vmatpush1.msra.mxu0 %v1595_v14 }
 0x74d   : > { %1879 = vmatmul.mubr.msk.f32.vlgmr.msra.gmra.mrb[6].mxu0 %vm446_vm11, %v1878_v40 }
 0x758   : > { %v1774_v15 = vpop.permute.xlu1 %1773  ;;  %v1781_v17 = vpop.permute.xlu0 %1780 }
 0x75d   : > { %v1791_v20 = vpop.permute.xlu1 %1790  ;;  %v1798_v23 = vpop.permute.xlu0 %1797 }
 0x81d   : > { %v1765_v16 = vpop.f32.mrb[6].mxu1 }
 0x81e   : > { %v1778_v12 = vmul.f32 %v1774_v15, %v1765_v16  ;;  %v2007_v6 = vpop.f32.mrb[7].mxu1 }
 0x820   : > { %v1785_v31 = vadd.f32 %v1781_v17, %v1778_v12  ;;  %v1694_v36 = vpop.f32.mrb[6].mxu0 }
 0x821   : > { %v1776_v18 = vmul.f32 %v1774_v15, %v1694_v36  ;;  %v1696_v19 = vpop.f32.mrb[7].mxu0 }
 0x822   : > { %v1788_v21 = vmax.f32 %v1785_v31, 0.0  ;;  %v1777_v22 = vmul.f32 %v1774_v15, %v1696_v19 }
 0x823   : > { %v1783_v24 = vadd.f32 %v1781_v17, %v1776_v18 }
 0x824   : > { %v1784_v25 = vadd.f32 %v1781_v17, %v1777_v22  ;;  %v1795_v26 = vmul.f32 %v1791_v20, %v1788_v21 }
 0x825   : > { %v1786_v27 = vmax.f32 %v1783_v24, 0.0 }
 0x826   : > { %v1787_v29 = vmax.f32 %v1784_v25, 0.0  ;;  %v1802_v33 = vadd.f32 %v1798_v23, %v1795_v26 }
 0x827   : > { %v1793_v1 = vmul.f32 %v1791_v20, %v1786_v27 }
 0x828   : > { %v1794_v38 = vmul.f32 %v1791_v20, %v1787_v29  ;;  %1805 = vst.msk [vmem:[%s197_s27 + $0x10] sm:$0xff] %vm227_vm0, %v1802_v33 }
 0x829   : > { %v1800_v28 = vadd.f32 %v1798_v23, %v1793_v1 }
 0x82a   : > { %v1801_v43 = vadd.f32 %v1798_v23, %v1794_v38 }
 0x82b   : > { %1803 = vst [vmem:[%s197_s27] sm:$0xff] %v1800_v28 }
 0x82c   : > { %1804 = vst [vmem:[%s197_s27 + $0x8] sm:$0xff] %v1801_v43 }
 0x82d PF: > { %s14_s15 = sadd.s32 1, %s2687_s15  }
 0x82e   : > { %p11_p4 = scmp.ge.s32.totalorder %s14_s15, 4  }
 0x830   :  { %13 = sbr.rel (!%p11_p4) target bundleno = 1 (0x1), region = 72 }

</bundles_post_ra>
